<compile_context>
chip_gen: v5e
topology: v5e:2x2
jax: 0.10.0
libtpu: 0.0.40
codegen_flags: <defaults>
</compile_context>

<pallas_src>
import functools

import jax
import jax.numpy as jnp
from jax.experimental import pallas as pl
from jax.experimental.pallas import tpu as pltpu


def _round_up(x, m):
    return ((x + m - 1) // m) * m


# ----------------------------------------------------------------------------
# Kernel 1: 3x3 conv (9 shift-and-accumulate matmuls on the flattened padded
# image) + bias + ReLU + wrap-column mask + global-average-pool.
# Grid: (B,), batch-parallel (megacore on v7x); each step writes its own
# (1, 1, Cf) pooled block, so no cross-step accumulation is needed.
# ----------------------------------------------------------------------------
def conv_pool_kernel(x_ref, w_ref, b_ref, mask_ref, pooled_ref, *, H, W, inv_hw):
    Wp = W + 2                       # padded row width
    M = H * Wp                       # conv rows incl. the 2 wrap columns / row
    Cf = pooled_ref.shape[-1]

    acc = jnp.zeros((M, Cf), jnp.float32)
    for dy in range(3):
        for dx in range(3):
            # Tap (dy, dx) of output pixel m reads flattened padded pixel
            # m + dy*Wp + dx (static contiguous slice -> no gather, no im2col).
            off = dy * Wp + dx
            lhs = x_ref[0, off:off + M, :].astype(jnp.bfloat16)      # (M, Cin')
            acc = acc + jnp.dot(lhs, w_ref[3 * dy + dx],
                                preferred_element_type=jnp.float32)  # (M, Cf)

    # Bias + ReLU in f32, THEN mask the two wrap columns of every row so that
    # ReLU(0 + bias) from padding can never corrupt the pooled mean.
    h = jnp.maximum(acc + b_ref[...], 0.0) * mask_ref[...]           # (M, Cf)
    pooled_ref[...] = (jnp.sum(h, axis=0, keepdims=True) * inv_hw)[None]


# ----------------------------------------------------------------------------
# Kernel 2: head -- Linear(feat_dim -> embed_size) + BatchNorm1d (training
# mode: biased batch statistics, eps=1e-5).  Tiny, runs once, kept un-fused
# because kernel 1's batch axis is core-parallel.
# ----------------------------------------------------------------------------
def head_kernel(pooled_ref, wl_ref, bl_ref, gamma_ref, beta_ref, out_ref):
    y = jnp.dot(pooled_ref[...].astype(jnp.bfloat16), wl_ref[...],
                preferred_element_type=jnp.float32) + bl_ref[...]    # (B, E)
    mu = jnp.mean(y, axis=0, keepdims=True)
    var = jnp.mean((y - mu) ** 2, axis=0, keepdims=True)
    out_ref[...] = (gamma_ref[...] * (y - mu) * jax.lax.rsqrt(var + 1e-5)
                    + beta_ref[...])


def encoder_cnn_forward(images, params):
    B, Cin, H, W = images.shape
    Cf = params["wc"].shape[1]
    E = params["wl"].shape[1]
    Hp, Wp = H + 2, W + 2
    M = H * Wp                                  # conv rows incl. wrap columns
    Cp = max(8, _round_up(Cin, 8))              # sublane-friendly channel pad
    L = _round_up(Hp * Wp + 2, 8)               # 1 shift + padded image + slack

    # NCHW -> NHWC -> zero-pad 1px spatially (+channel pad) -> flatten spatial
    # -> shift by one element so all 9 tap offsets are non-negative.
    x = jnp.transpose(images, (0, 2, 3, 1))                          # (B,H,W,C)
    xp = jnp.pad(x, ((0, 0), (1, 1), (1, 1), (0, Cp - Cin)))         # (B,Hp,Wp,Cp)
    xf = xp.reshape(B, Hp * Wp, Cp)
    xf = jnp.pad(xf, ((0, 0), (1, L - 1 - Hp * Wp), (0, 0)))         # (B,L,Cp) f32

    # 9 weight slabs (tap-major), channel-padded, bf16 MXU operands.
    wc9 = jnp.pad(params["wc"].astype(jnp.bfloat16).reshape(9, Cin, Cf),
                  ((0, 0), (0, Cp - Cin), (0, 0)))                   # (9,Cp,Cf)

    # Valid-column mask over the Wp-wide flattened rows (kills wrap columns).
    col = jnp.arange(M, dtype=jnp.int32) % Wp
    mask = ((col >= 1) & (col <= W)).astype(jnp.float32).reshape(M, 1)

    pooled3 = pl.pallas_call(
        functools.partial(conv_pool_kernel, H=H, W=W, inv_hw=1.0 / float(H * W)),
        out_shape=jax.ShapeDtypeStruct((B, 1, Cf), jnp.float32),
        grid=(B,),
        in_specs=[
            pl.BlockSpec((1, L, Cp), lambda b: (b, 0, 0)),     # one image / step
            pl.BlockSpec((9, Cp, Cf), lambda b: (0, 0, 0)),    # resident weights
            pl.BlockSpec((1, Cf), lambda b: (0, 0)),           # conv bias
            pl.BlockSpec((M, 1), lambda b: (0, 0)),            # wrap-column mask
        ],
        out_specs=pl.BlockSpec((1, 1, Cf), lambda b: (b, 0, 0)),
        compiler_params=pltpu.CompilerParams(
            dimension_semantics=("parallel",),                 # megacore on v7x
            vmem_limit_bytes=48 * 1024 * 1024),                # safe on 64 MiB v7x
    )(xf, wc9, params["bc"], mask)

    pooled = pooled3.reshape(B, Cf)

    out = pl.pallas_call(
        head_kernel,
        out_shape=jax.ShapeDtypeStruct((B, E), jnp.float32),
        grid=(1,),
        in_specs=[
            pl.BlockSpec((B, Cf), lambda i: (0, 0)),
            pl.BlockSpec((Cf, E), lambda i: (0, 0)),
            pl.BlockSpec((1, E), lambda i: (0, 0)),
            pl.BlockSpec((1, E), lambda i: (0, 0)),
            pl.BlockSpec((1, E), lambda i: (0, 0)),
        ],
        out_specs=pl.BlockSpec((B, E), lambda i: (0, 0)),
    )(pooled, params["wl"].astype(jnp.bfloat16), params["bl"],
      params["gamma"], params["beta"])
    return out


def encoder_cnn_reference(images, params):
    """Plain-JAX reference of the identical math (same bf16 operand casts)."""
    B, Cin, H, W = images.shape
    Cf = params["wc"].shape[1]
    x = jnp.transpose(images, (0, 2, 3, 1))
    xp = jnp.pad(x, ((0, 0), (1, 1), (1, 1), (0, 0))).astype(jnp.bfloat16)
    w = params["wc"].astype(jnp.bfloat16).reshape(3, 3, Cin, Cf)
    acc = jnp.zeros((B, H, W, Cf), jnp.float32)
    for dy in range(3):
        for dx in range(3):
            acc = acc + jnp.einsum("bhwc,cf->bhwf",
                                   xp[:, dy:dy + H, dx:dx + W, :], w[dy, dx],
                                   preferred_element_type=jnp.float32)
    h = jnp.maximum(acc + params["bc"].reshape(1, 1, 1, Cf), 0.0)
    pooled = h.reshape(B, H * W, Cf).mean(axis=1)
    y = (jnp.dot(pooled.astype(jnp.bfloat16),
                 params["wl"].astype(jnp.bfloat16),
                 preferred_element_type=jnp.float32) + params["bl"])
    mu = y.mean(axis=0, keepdims=True)
    var = ((y - mu) ** 2).mean(axis=0, keepdims=True)
    return params["gamma"] * (y - mu) * jax.lax.rsqrt(var + 1e-5) + params["beta"]


def make_params(key, cin, feat_dim, embed_size):
    k = jax.random.split(key, 4)
    return {
        "wc": jax.random.normal(k[0], (9 * cin, feat_dim), jnp.float32) * 0.05,
        "bc": jax.random.normal(k[1], (1, feat_dim), jnp.float32) * 0.01,
        "wl": jax.random.normal(k[2], (feat_dim, embed_size), jnp.float32) * 0.05,
        "bl": jax.random.normal(k[3], (1, embed_size), jnp.float32) * 0.01,
        "gamma": jnp.ones((1, embed_size), jnp.float32),   # BatchNorm1d weight
        "beta": jnp.zeros((1, embed_size), jnp.float32),   # BatchNorm1d bias
    }


if __name__ == "__main__":
    B, Cin, H, W = 2, 4, 16, 16          # small NCHW images
    FEAT_DIM = 128                        # stands in for resnet.fc.in_features
    EMBED_SIZE = 32

    key = jax.random.PRNGKey(0)
    k_img, k_par = jax.random.split(key)
    images = jax.random.normal(k_img, (B, Cin, H, W), jnp.float32)
    params = make_params(k_par, Cin, FEAT_DIM, EMBED_SIZE)

    out = jax.block_until_ready(encoder_cnn_forward(images, params))

    ref = encoder_cnn_reference(images, params)
    assert out.shape == (B, EMBED_SIZE)
    # Both paths use identical bf16 quantization of inputs/weights; remaining
    # differences are f32 accumulation order, whose worst-case amplification
    # through BatchNorm1d is capped by eps=1e-5 well below this tolerance.
    assert jnp.allclose(out, ref, atol=1e-2, rtol=1e-2), "mismatch vs reference"

    print("KERNEL_OK")
</pallas_src>

<mosaic_0001>
module attributes {stable_mosaic.version = 11 : i64} {
  func.func @conv_pool_kernel(%arg0: i32, %arg1: memref<1x328x8xf32, #tpu.memory_space<vmem>>, %arg2: memref<9x8x128xbf16, #tpu.memory_space<vmem>>, %arg3: memref<1x128xf32, #tpu.memory_space<vmem>>, %arg4: memref<288x1xf32, #tpu.memory_space<vmem>>, %arg5: memref<1x1x128xf32, #tpu.memory_space<vmem>>) attributes {dimension_semantics = [#tpu.dimension_semantics<parallel>], iteration_bounds = array<i64: 2>, scalar_prefetch = 0 : i64, scratch_operands = 0 : i64, tpu.core_type = #tpu.core_type<tc>, window_params = [{transform_indices = @transform_0, window_bounds = array<i64: 1, 328, 8>}, {pipeline_mode = #tpu.pipeline_mode<synchronous>, transform_indices = @transform_1, window_bounds = array<i64: 9, 8, 128>}, {pipeline_mode = #tpu.pipeline_mode<synchronous>, transform_indices = @transform_2, window_bounds = array<i64: 1, 128>}, {pipeline_mode = #tpu.pipeline_mode<synchronous>, transform_indices = @transform_3, window_bounds = array<i64: 288, 1>}, {transform_indices = @transform_4, window_bounds = array<i64: 1, 1, 128>}]} {
    %cst = arith.constant 0.000000e+00 : f32
    %0 = vector.broadcast %cst : f32 to vector<288x128xf32>
    %c0 = arith.constant 0 : index
    %c0_0 = arith.constant 0 : index
    %c0_1 = arith.constant 0 : index
    %1 = vector.load %arg1[%c0, %c0_0, %c0_1] : memref<1x328x8xf32, #tpu.memory_space<vmem>>, vector<1x288x8xf32>
    %2 = vector.shape_cast %1 : vector<1x288x8xf32> to vector<288x8xf32>
    %3 = arith.truncf %2 : vector<288x8xf32> to vector<288x8xbf16>
    %c0_2 = arith.constant 0 : index
    %c0_3 = arith.constant 0 : index
    %c0_4 = arith.constant 0 : index
    %4 = vector.load %arg2[%c0_2, %c0_3, %c0_4] : memref<9x8x128xbf16, #tpu.memory_space<vmem>>, vector<1x8x128xbf16>
    %5 = vector.shape_cast %4 : vector<1x8x128xbf16> to vector<8x128xbf16>
    %cst_5 = arith.constant dense<0.000000e+00> : vector<288x128xf32>
    %6 = tpu.matmul %3, %5, %cst_5 {dimension_numbers = #tpu.dot_dimension_numbers<[1], [0], [0], [1], [0, 0, 1, 1], [], []>} : vector<288x8xbf16>, vector<8x128xbf16>, vector<288x128xf32> -> vector<288x128xf32>
    %7 = arith.addf %0, %6 : vector<288x128xf32>
    %c0_6 = arith.constant 0 : index
    %c1 = arith.constant 1 : index
    %c0_7 = arith.constant 0 : index
    %8 = vector.load %arg1[%c0_6, %c1, %c0_7] : memref<1x328x8xf32, #tpu.memory_space<vmem>>, vector<1x288x8xf32>
    %9 = vector.shape_cast %8 : vector<1x288x8xf32> to vector<288x8xf32>
    %10 = arith.truncf %9 : vector<288x8xf32> to vector<288x8xbf16>
    %c1_8 = arith.constant 1 : index
    %c0_9 = arith.constant 0 : index
    %c0_10 = arith.constant 0 : index
    %11 = vector.load %arg2[%c1_8, %c0_9, %c0_10] : memref<9x8x128xbf16, #tpu.memory_space<vmem>>, vector<1x8x128xbf16>
    %12 = vector.shape_cast %11 : vector<1x8x128xbf16> to vector<8x128xbf16>
    %cst_11 = arith.constant dense<0.000000e+00> : vector<288x128xf32>
    %13 = tpu.matmul %10, %12, %cst_11 {dimension_numbers = #tpu.dot_dimension_numbers<[1], [0], [0], [1], [0, 0, 1, 1], [], []>} : vector<288x8xbf16>, vector<8x128xbf16>, vector<288x128xf32> -> vector<288x128xf32>
    %14 = arith.addf %7, %13 : vector<288x128xf32>
    %c0_12 = arith.constant 0 : index
    %c2 = arith.constant 2 : index
    %c0_13 = arith.constant 0 : index
    %15 = vector.load %arg1[%c0_12, %c2, %c0_13] : memref<1x328x8xf32, #tpu.memory_space<vmem>>, vector<1x288x8xf32>
    %16 = vector.shape_cast %15 : vector<1x288x8xf32> to vector<288x8xf32>
    %17 = arith.truncf %16 : vector<288x8xf32> to vector<288x8xbf16>
    %c2_14 = arith.constant 2 : index
    %c0_15 = arith.constant 0 : index
    %c0_16 = arith.constant 0 : index
    %18 = vector.load %arg2[%c2_14, %c0_15, %c0_16] : memref<9x8x128xbf16, #tpu.memory_space<vmem>>, vector<1x8x128xbf16>
    %19 = vector.shape_cast %18 : vector<1x8x128xbf16> to vector<8x128xbf16>
    %cst_17 = arith.constant dense<0.000000e+00> : vector<288x128xf32>
    %20 = tpu.matmul %17, %19, %cst_17 {dimension_numbers = #tpu.dot_dimension_numbers<[1], [0], [0], [1], [0, 0, 1, 1], [], []>} : vector<288x8xbf16>, vector<8x128xbf16>, vector<288x128xf32> -> vector<288x128xf32>
    %21 = arith.addf %14, %20 : vector<288x128xf32>
    %c0_18 = arith.constant 0 : index
    %c18 = arith.constant 18 : index
    %c0_19 = arith.constant 0 : index
    %22 = vector.load %arg1[%c0_18, %c18, %c0_19] : memref<1x328x8xf32, #tpu.memory_space<vmem>>, vector<1x288x8xf32>
    %23 = vector.shape_cast %22 : vector<1x288x8xf32> to vector<288x8xf32>
    %24 = arith.truncf %23 : vector<288x8xf32> to vector<288x8xbf16>
    %c3 = arith.constant 3 : index
    %c0_20 = arith.constant 0 : index
    %c0_21 = arith.constant 0 : index
    %25 = vector.load %arg2[%c3, %c0_20, %c0_21] : memref<9x8x128xbf16, #tpu.memory_space<vmem>>, vector<1x8x128xbf16>
    %26 = vector.shape_cast %25 : vector<1x8x128xbf16> to vector<8x128xbf16>
    %cst_22 = arith.constant dense<0.000000e+00> : vector<288x128xf32>
    %27 = tpu.matmul %24, %26, %cst_22 {dimension_numbers = #tpu.dot_dimension_numbers<[1], [0], [0], [1], [0, 0, 1, 1], [], []>} : vector<288x8xbf16>, vector<8x128xbf16>, vector<288x128xf32> -> vector<288x128xf32>
    %28 = arith.addf %21, %27 : vector<288x128xf32>
    %c0_23 = arith.constant 0 : index
    %c19 = arith.constant 19 : index
    %c0_24 = arith.constant 0 : index
    %29 = vector.load %arg1[%c0_23, %c19, %c0_24] : memref<1x328x8xf32, #tpu.memory_space<vmem>>, vector<1x288x8xf32>
    %30 = vector.shape_cast %29 : vector<1x288x8xf32> to vector<288x8xf32>
    %31 = arith.truncf %30 : vector<288x8xf32> to vector<288x8xbf16>
    %c4 = arith.constant 4 : index
    %c0_25 = arith.constant 0 : index
    %c0_26 = arith.constant 0 : index
    %32 = vector.load %arg2[%c4, %c0_25, %c0_26] : memref<9x8x128xbf16, #tpu.memory_space<vmem>>, vector<1x8x128xbf16>
    %33 = vector.shape_cast %32 : vector<1x8x128xbf16> to vector<8x128xbf16>
    %cst_27 = arith.constant dense<0.000000e+00> : vector<288x128xf32>
    %34 = tpu.matmul %31, %33, %cst_27 {dimension_numbers = #tpu.dot_dimension_numbers<[1], [0], [0], [1], [0, 0, 1, 1], [], []>} : vector<288x8xbf16>, vector<8x128xbf16>, vector<288x128xf32> -> vector<288x128xf32>
    %35 = arith.addf %28, %34 : vector<288x128xf32>
    %c0_28 = arith.constant 0 : index
    %c20 = arith.constant 20 : index
    %c0_29 = arith.constant 0 : index
    %36 = vector.load %arg1[%c0_28, %c20, %c0_29] : memref<1x328x8xf32, #tpu.memory_space<vmem>>, vector<1x288x8xf32>
    %37 = vector.shape_cast %36 : vector<1x288x8xf32> to vector<288x8xf32>
    %38 = arith.truncf %37 : vector<288x8xf32> to vector<288x8xbf16>
    %c5 = arith.constant 5 : index
    %c0_30 = arith.constant 0 : index
    %c0_31 = arith.constant 0 : index
    %39 = vector.load %arg2[%c5, %c0_30, %c0_31] : memref<9x8x128xbf16, #tpu.memory_space<vmem>>, vector<1x8x128xbf16>
    %40 = vector.shape_cast %39 : vector<1x8x128xbf16> to vector<8x128xbf16>
    %cst_32 = arith.constant dense<0.000000e+00> : vector<288x128xf32>
    %41 = tpu.matmul %38, %40, %cst_32 {dimension_numbers = #tpu.dot_dimension_numbers<[1], [0], [0], [1], [0, 0, 1, 1], [], []>} : vector<288x8xbf16>, vector<8x128xbf16>, vector<288x128xf32> -> vector<288x128xf32>
    %42 = arith.addf %35, %41 : vector<288x128xf32>
    %c0_33 = arith.constant 0 : index
    %c36 = arith.constant 36 : index
    %c0_34 = arith.constant 0 : index
    %43 = vector.load %arg1[%c0_33, %c36, %c0_34] : memref<1x328x8xf32, #tpu.memory_space<vmem>>, vector<1x288x8xf32>
    %44 = vector.shape_cast %43 : vector<1x288x8xf32> to vector<288x8xf32>
    %45 = arith.truncf %44 : vector<288x8xf32> to vector<288x8xbf16>
    %c6 = arith.constant 6 : index
    %c0_35 = arith.constant 0 : index
    %c0_36 = arith.constant 0 : index
    %46 = vector.load %arg2[%c6, %c0_35, %c0_36] : memref<9x8x128xbf16, #tpu.memory_space<vmem>>, vector<1x8x128xbf16>
    %47 = vector.shape_cast %46 : vector<1x8x128xbf16> to vector<8x128xbf16>
    %cst_37 = arith.constant dense<0.000000e+00> : vector<288x128xf32>
    %48 = tpu.matmul %45, %47, %cst_37 {dimension_numbers = #tpu.dot_dimension_numbers<[1], [0], [0], [1], [0, 0, 1, 1], [], []>} : vector<288x8xbf16>, vector<8x128xbf16>, vector<288x128xf32> -> vector<288x128xf32>
    %49 = arith.addf %42, %48 : vector<288x128xf32>
    %c0_38 = arith.constant 0 : index
    %c37 = arith.constant 37 : index
    %c0_39 = arith.constant 0 : index
    %50 = vector.load %arg1[%c0_38, %c37, %c0_39] : memref<1x328x8xf32, #tpu.memory_space<vmem>>, vector<1x288x8xf32>
    %51 = vector.shape_cast %50 : vector<1x288x8xf32> to vector<288x8xf32>
    %52 = arith.truncf %51 : vector<288x8xf32> to vector<288x8xbf16>
    %c7 = arith.constant 7 : index
    %c0_40 = arith.constant 0 : index
    %c0_41 = arith.constant 0 : index
    %53 = vector.load %arg2[%c7, %c0_40, %c0_41] : memref<9x8x128xbf16, #tpu.memory_space<vmem>>, vector<1x8x128xbf16>
    %54 = vector.shape_cast %53 : vector<1x8x128xbf16> to vector<8x128xbf16>
    %cst_42 = arith.constant dense<0.000000e+00> : vector<288x128xf32>
    %55 = tpu.matmul %52, %54, %cst_42 {dimension_numbers = #tpu.dot_dimension_numbers<[1], [0], [0], [1], [0, 0, 1, 1], [], []>} : vector<288x8xbf16>, vector<8x128xbf16>, vector<288x128xf32> -> vector<288x128xf32>
    %56 = arith.addf %49, %55 : vector<288x128xf32>
    %c0_43 = arith.constant 0 : index
    %c38 = arith.constant 38 : index
    %c0_44 = arith.constant 0 : index
    %57 = vector.load %arg1[%c0_43, %c38, %c0_44] : memref<1x328x8xf32, #tpu.memory_space<vmem>>, vector<1x288x8xf32>
    %58 = vector.shape_cast %57 : vector<1x288x8xf32> to vector<288x8xf32>
    %59 = arith.truncf %58 : vector<288x8xf32> to vector<288x8xbf16>
    %c8 = arith.constant 8 : index
    %c0_45 = arith.constant 0 : index
    %c0_46 = arith.constant 0 : index
    %60 = vector.load %arg2[%c8, %c0_45, %c0_46] : memref<9x8x128xbf16, #tpu.memory_space<vmem>>, vector<1x8x128xbf16>
    %61 = vector.shape_cast %60 : vector<1x8x128xbf16> to vector<8x128xbf16>
    %cst_47 = arith.constant dense<0.000000e+00> : vector<288x128xf32>
    %62 = tpu.matmul %59, %61, %cst_47 {dimension_numbers = #tpu.dot_dimension_numbers<[1], [0], [0], [1], [0, 0, 1, 1], [], []>} : vector<288x8xbf16>, vector<8x128xbf16>, vector<288x128xf32> -> vector<288x128xf32>
    %63 = arith.addf %56, %62 : vector<288x128xf32>
    %c0_48 = arith.constant 0 : index
    %c0_49 = arith.constant 0 : index
    %64 = vector.load %arg3[%c0_48, %c0_49] : memref<1x128xf32, #tpu.memory_space<vmem>>, vector<1x128xf32>
    %65 = vector.broadcast %64 : vector<1x128xf32> to vector<288x128xf32>
    %66 = arith.addf %63, %65 : vector<288x128xf32>
    %cst_50 = arith.constant 0.000000e+00 : f32
    %67 = vector.broadcast %cst_50 : f32 to vector<288x128xf32>
    %68 = arith.maximumf %66, %67 : vector<288x128xf32>
    %c0_51 = arith.constant 0 : index
    %c0_52 = arith.constant 0 : index
    %69 = vector.load %arg4[%c0_51, %c0_52] : memref<288x1xf32, #tpu.memory_space<vmem>>, vector<288x1xf32>
    %70 = vector.broadcast %69 : vector<288x1xf32> to vector<288x128xf32>
    %71 = arith.mulf %68, %70 : vector<288x128xf32>
    %cst_53 = arith.constant dense<0.000000e+00> : vector<128xf32>
    %72 = vector.multi_reduction <add>, %71, %cst_53 [0] : vector<288x128xf32> to vector<128xf32>
    %73 = vector.shape_cast %72 : vector<128xf32> to vector<1x128xf32>
    %cst_54 = arith.constant 3.906250e-03 : f32
    %74 = vector.broadcast %cst_54 : f32 to vector<1x128xf32>
    %75 = arith.mulf %73, %74 : vector<1x128xf32>
    %76 = vector.shape_cast %75 : vector<1x128xf32> to vector<1x1x128xf32>
    %c0_55 = arith.constant 0 : index
    %c0_56 = arith.constant 0 : index
    %c0_57 = arith.constant 0 : index
    %77 = vector.load %arg5[%c0_55, %c0_56, %c0_57] : memref<1x1x128xf32, #tpu.memory_space<vmem>>, vector<1x1x128xf32>
    tpu.vector_store %arg5[%c0_55, %c0_56, %c0_57], %76 {strides = array<i32>} : memref<1x1x128xf32, #tpu.memory_space<vmem>>, vector<1x1x128xf32>,
    return
  }
  func.func @transform_0(%arg0: i32) -> (i32, i32, i32) {
    %c0_i32 = arith.constant 0 : i32
    %c0_i32_0 = arith.constant 0 : i32
    %c0_i32_1 = arith.constant 0 : i32
    return %arg0, %c0_i32, %c0_i32_0 : i32, i32, i32
  }
  func.func @transform_1(%arg0: i32) -> (i32, i32, i32) {
    %c0_i32 = arith.constant 0 : i32
    %c0_i32_0 = arith.constant 0 : i32
    %c0_i32_1 = arith.constant 0 : i32
    %c0_i32_2 = arith.constant 0 : i32
    return %c0_i32, %c0_i32_0, %c0_i32_1 : i32, i32, i32
  }
  func.func @transform_2(%arg0: i32) -> (i32, i32) {
    %c0_i32 = arith.constant 0 : i32
    %c0_i32_0 = arith.constant 0 : i32
    %c0_i32_1 = arith.constant 0 : i32
    return %c0_i32, %c0_i32_0 : i32, i32
  }
  func.func @transform_3(%arg0: i32) -> (i32, i32) {
    %c0_i32 = arith.constant 0 : i32
    %c0_i32_0 = arith.constant 0 : i32
    %c0_i32_1 = arith.constant 0 : i32
    return %c0_i32, %c0_i32_0 : i32, i32
  }
  func.func @transform_4(%arg0: i32) -> (i32, i32, i32) {
    %c0_i32 = arith.constant 0 : i32
    %c0_i32_0 = arith.constant 0 : i32
    %c0_i32_1 = arith.constant 0 : i32
    return %arg0, %c0_i32, %c0_i32_0 : i32, i32, i32
  }
}

</mosaic_0001>

<bundles_post_ra>
// kernel: tpu_custom_call.1
= control target key start
LH: loop header
LB: loop body
LE: loop exit
PB: predicated region body
PF: predicated region fallthrough
CT: control target
= control target key end

     0   :  { %9 = vsyncpa [#allocation3], 0  ;;  %s4173_s0 = inlined_call_operand.vmem [shape: f32[2,328,8], index: 0, kind: input, shape index: {}]   ;;  %s4174_s1 = inlined_call_operand.vmem [shape: bf16[9,8,128], index: 1, kind: input, shape index: {}]   ;;  %s4175_s2 = inlined_call_operand.vmem [shape: f32[1,128], index: 2, kind: input, shape index: {}]   ;;  %s4176_s3 = inlined_call_operand.vmem [shape: f32[288,1], index: 3, kind: input, shape index: {}]   ;;  %s4177_s4 = inlined_call_operand.hbm [shape: f32[2,1,128], index: 4, kind: output, shape index: {}]  }
   0x1   :  { %11 = vsyncpa [#allocation3 + $0x1], 0  ;;  %s3112_s15 = smov 0   ;;  %s3114_s16 = smov 0  }
   0x2   :  { %s3116_s17 = smov 0   ;;  %s3118_s18 = smov 0  }
   0x3 LB: > { %s3133_s19 = sadd.s32 4294967295, %s3084_s18   ;;  %s2796_s20 = sadd.s32 4294967294, %s3084_s18   ;;  %s3084_s18 = sphi %s3118_s18, %s4183_s18   ;;  %s3080_s17 = sphi %s3116_s17, %s4182_s17   ;;  %s3076_s16 = sphi %s3114_s16, %s4181_s16   ;;  %s3072_s15 = sphi %s3112_s15, %s4180_s15  }
   0x4   : > { %s3137_s21 = sadd.s32 1, %s3084_s18   ;;  %s113_s22 = sadd.s32 1, %s3080_s17 }
   0x5   : > { %s110_s23 = ssub.s32 %s3084_s18, %s3137_s21  ;;  %p123_p0 = scmp.ne.s32.totalorder %s3080_s17, %s3076_s16 }
   0x6   : > { %p111_p1 = scmp.eq.s32.totalorder %s110_s23, 0  ;;  %p124_p2 = scmp.eq.s32.totalorder %s3133_s19, 1 }
   0x7   : > { %p129_p3 = scmp.ne.s32.totalorder %s3076_s16, %s3072_s15  ;;  %p130_p4 = scmp.eq.s32.totalorder %s2796_s20, 1 }
   0x8   : > { %s3148_s24 = scalar_select %p111_p1, %s3080_s17, %s113_s22  }
   0x9   : > { %p3150_p5 = por %p124_p2, %p123_p0  ;;  %p3154_p6 = por %p130_p4, %p129_p3 }
   0xa   : > { %p2799_p7 = scmp.ge.s32.totalorder %s3084_s18, 1  ;;  %p165_p8 = scmp.lt.s32.totalorder %s3084_s18, 3 }
   0xc   : > { %p166_p9 = pnand %p2799_p7, %p165_p8 }
   0xd   : > { %p190_p10 = scmp.lt.s32.totalorder (!%p166_p9), %s3133_s19, 1  ;;  %s188_s28 = sand.u32 (!%p166_p9), 1, %s3076_s16  }
   0xe   : > { %169 = sbr.rel (%p166_p9) target bundleno = 839 (0x347), region = 36  ;;  %s2737_s5 = scalar_lea.hbm (!%p166_p9), %s4177_s4, %s3133_s19 }
   0xf   : > { %s189_s6 = scalar_lea.vmem (!%p166_p9), [#allocation2], %s188_s28  ;;  %s2741_s8 = sshll.u32 (!%p166_p9), %s2737_s5, 4  ;;  %s2742_s8 = int_to_ptr.hbm [resolvable:$true] %s2741_s8 }
  0x10   : > { %s2729_s9 = scalar_lea.sflag (!%p166_p9), [#allocation3], %s188_s28 }
  0x13   : > { %v2801_v0 = vld [vmem:[%s4174_s1 + $0x4] sm:$0xf]  ;;  %vm362_vm0 = vcmask 1043456   ;;  %v2838_v2 = vld [vmem:[%s4174_s1 + $0x8] sm:$0xf]  ;;  %s191_s7 = scalar_select %p190_p10, %s3133_s19, 1 }
  0x14   : > { %v364_v1 = vsel %vm362_vm0, %v2801_v0, 0  ;;  %v250_v3 = vld [vmem:[%s4174_s1] sm:$0xf]  ;;  %v732_v4 = vsel %vm362_vm0, %v2838_v2, 0  ;;  %v2876_v6 = vld [vmem:[%s4174_s1 + $0x10] sm:$0xf] }
  0x15   : > { %2973 = vmatpush.bf16.msra.mxu1 %v364_v1  ;;  %2974 = vmatpush.bf16.msra.mxu2 %v364_v1  ;;  %v520_v5 = vsel %vm362_vm0, %v250_v3, 0  ;;  %v1228_v7 = vsel %vm362_vm0, %v2876_v6, 0  ;;  %s2976_s10 = smul.u32 328, %s191_s7  ;;  %vm307_vm1 = vcmask 64512   ;;  %v2857_v20 = vld [vmem:[%s4174_s1 + $0xc] sm:$0xf] }
  0x16   : > { %373 = vmatpush.bf16.msra.mxu0 %v364_v1  ;;  %2975 = vmatpush.bf16.msra.mxu3 %v364_v1  ;;  %v980_v21 = vsel %vm362_vm0, %v2857_v20, 0  ;;  %v2914_v58 = vld [vmem:[%s4174_s1 + $0x18] sm:$0xf]  ;;  %v2933_v59 = vld [vmem:[%s4174_s1 + $0x1c] sm:$0xf]  ;;  %s2739_s7 = sshll.u32 %s189_s6, 4  ;;  %s2740_s7 = int_to_ptr.vmem [resolvable:$true] %s2739_s7 }
  0x17   : > { %s3181_s13 = scalar_lea.vmem %s4173_s0, %s2976_s10  ;;  %v2895_v60 = vld [vmem:[%s4174_s1 + $0x14] sm:$0xf]  ;;  %v1724_v61 = vsel %vm362_vm0, %v2914_v58, 0  ;;  %v1972_v62 = vsel %vm362_vm0, %v2933_v59, 0  ;;  %v2952_v0 = vld [vmem:[%s4174_s1 + $0x20] sm:$0xf] }
  0x18   : > { %v261_v8 = vld [vmem:[%s3181_s13 + $0x51] sm:$0xff]  ;;  %v262_v9 = vld [vmem:[%s3181_s13 + $0x59] sm:$0xff]  ;;  %v271_v10 = vld [vmem:[%s3181_s13 + $0xa1] sm:$0xff]  ;;  %v1476_v63 = vsel %vm362_vm0, %v2895_v60, 0  ;;  %v2220_v1 = vsel %vm362_vm0, %v2952_v0, 0  ;;  %s3036_s10 = sshra.s32 %s2742_s8, 4  ;;  %s3037_s10 = int_to_ptr.hbm [resolvable:$true] %s3036_s10 }
  0x19   : > { %741 = vmatpush.bf16.msrb.mxu2 %v732_v4  ;;  %529 = vmatpush.bf16.msrb.mxu1 %v520_v5  ;;  %v292_v11 = vpack.c.bf16 %v262_v9, %v261_v8  ;;  %v272_v12 = vld [vmem:[%s3181_s13 + $0xa9] sm:$0xff]  ;;  %v251_v13 = vld [vmem:[%s3181_s13 + $0x1] sm:$0xff]  ;;  %v281_v17 = vld [vmem:[%s3181_s13 + $0xf1] sm:$0xff]  ;;  %s3038_s11 = scalar_lea.hbm %s3037_s10, 1  ;;  %s3042_s19 = scalar_lea.hbm %s4177_s4, 2 }
  0x1a   : > { %1237 = vmatpush.bf16.msrb.mxu0 %v1228_v7  ;;  %v252_v14 = vld [vmem:[%s3181_s13 + $0x9] sm:$0xff]  ;;  %v297_v15 = vpack.c.bf16 %v272_v12, %v271_v10  ;;  %v282_v18 = vld [vmem:[%s3181_s13 + $0xf9] sm:$0xff]  ;;  %989 = vmatpush.bf16.msrb.mxu3 %v980_v21  ;;  %v263_v22 = vld [vmem:[%s3181_s13 + $0x61] sm:$0xff]  ;;  %p3039_p11 = scmp.ne.s32.totalorder %s3037_s10, %s3038_s11  ;;  %p3043_p0 = scmp.lt.s32.totalorder %s3037_s10, %s4177_s4 }
  0x1b   : > { %v287_v16 = vpack.c.bf16 %v252_v14, %v251_v13  ;;  %2807 = vmatmul.msk.bf16.vlgmr.msra.gmra.mxu1 %vm307_vm1, %v292_v11  ;;  %v302_v19 = vpack.c.bf16 %v282_v18, %v281_v17  ;;  %v264_v23 = vld [vmem:[%s3181_s13 + $0x69] sm:$0xff]  ;;  %v273_v24 = vld [vmem:[%s3181_s13 + $0xb1] sm:$0xff]  ;;  %v274_v25 = vld [vmem:[%s3181_s13 + $0xb9] sm:$0xff]  ;;  %p3044_p1 = scmp.lt.s32.totalorder %s3042_s19, %s3038_s11 }
  0x1c   : > { %2812 = vmatmul.msk.bf16.vlgmr.msra.gmra.mxu2 %vm307_vm1, %v297_v15  ;;  %v253_v26 = vld [vmem:[%s3181_s13 + $0x11] sm:$0xff]  ;;  %v254_v27 = vld [vmem:[%s3181_s13 + $0x19] sm:$0xff]  ;;  %v293_v28 = vpack.c.bf16 %v264_v23, %v263_v22  ;;  %v298_v29 = vpack.c.bf16 %v274_v25, %v273_v24  ;;  %v283_v31 = vld [vmem:[%s3181_s13 + $0x101] sm:$0xff]  ;;  %p3040_p12 = pnand %p3039_p11, %p3150_p5 }
  0x1d   : > { %2802 = vmatmul.msk.bf16.vlgmr.msra.gmra.mxu0 %vm307_vm1, %v287_v16  ;;  %2817 = vmatmul.msk.bf16.vlgmr.msra.gmra.mxu3 %vm307_vm1, %v302_v19  ;;  %v288_v30 = vpack.c.bf16 %v254_v27, %v253_v26  ;;  %v284_v32 = vld [vmem:[%s3181_s13 + $0x109] sm:$0xff]  ;;  %v265_v34 = vld [vmem:[%s3181_s13 + $0x71] sm:$0xff]  ;;  %v266_v35 = vld [vmem:[%s3181_s13 + $0x79] sm:$0xff]  ;;  %p3045_p2 = por %p3044_p1, %p3043_p0 }
  0x1e   : > { %v303_v33 = vpack.c.bf16 %v284_v32, %v283_v31  ;;  %v275_v36 = vld [vmem:[%s3181_s13 + $0xc1] sm:$0xff]  ;;  %v276_v37 = vld [vmem:[%s3181_s13 + $0xc9] sm:$0xff]  ;;  %v294_v40 = vpack.c.bf16 %v266_v35, %v265_v34  ;;  %v285_v43 = vld [vmem:[%s3181_s13 + $0x111] sm:$0xff]  ;;  %1733 = vmatpush.bf16.msra.mxu2 %v1724_v61  ;;  %1981 = vmatpush.bf16.msra.mxu3 %v1972_v62  ;;  %p3041_p13 = pneg %p3040_p12 }
  0x1f   : > { %v255_v38 = vld [vmem:[%s3181_s13 + $0x21] sm:$0xff]  ;;  %v256_v39 = vld [vmem:[%s3181_s13 + $0x29] sm:$0xff]  ;;  %v299_v41 = vpack.c.bf16 %v276_v37, %v275_v36  ;;  %v286_v44 = vld [vmem:[%s3181_s13 + $0x119] sm:$0xff]  ;;  %1485 = vmatpush.bf16.msra.mxu1 %v1476_v63  ;;  %2229 = vmatpush.bf16.msra.mxu0 %v2220_v1 }
  0x20   : > { %v289_v42 = vpack.c.bf16 %v256_v39, %v255_v38  ;;  %v304_v45 = vpack.c.bf16 %v286_v44, %v285_v43  ;;  %v267_v46 = vld [vmem:[%s3181_s13 + $0x81] sm:$0xff]  ;;  %v268_v47 = vld [vmem:[%s3181_s13 + $0x89] sm:$0xff]  ;;  %v277_v48 = vld [vmem:[%s3181_s13 + $0xd1] sm:$0xff]  ;;  %p3046_p3 = pnand %p3045_p2, %p3041_p13 }
  0x21   : > { %v278_v49 = vld [vmem:[%s3181_s13 + $0xd9] sm:$0xff]  ;;  %v257_v50 = vld [vmem:[%s3181_s13 + $0x31] sm:$0xff]  ;;  %v295_v52 = vpack.c.bf16 %v268_v47, %v267_v46  ;;  %v279_v4 = vld [vmem:[%s3181_s13 + $0xe1] sm:$0xff] }
  0x22   : > { %v258_v51 = vld [vmem:[%s3181_s13 + $0x39] sm:$0xff]  ;;  %v300_v53 = vpack.c.bf16 %v278_v49, %v277_v48  ;;  %v269_v2 = vld [vmem:[%s3181_s13 + $0x91] sm:$0xff]  ;;  %v280_v5 = vld [vmem:[%s3181_s13 + $0xe9] sm:$0xff] }
  0x23   : > { %v290_v54 = vpack.c.bf16 %v258_v51, %v257_v50  ;;  %v869_v55 = vld [vmem:[%s3181_s13 + $0x12] sm:$0xff]  ;;  %v870_v56 = vld [vmem:[%s3181_s13 + $0x1a] sm:$0xff]  ;;  %v260_v7 = vld [vmem:[%s3181_s13 + $0x49] sm:$0xff]  ;;  %v301_v9 = vpack.c.bf16 %v280_v5, %v279_v4 }
  0x24   : > { %v905_v57 = vpack.c.bf16 %v870_v56, %v869_v55  ;;  %v270_v3 = vld [vmem:[%s3181_s13 + $0x99] sm:$0xff]  ;;  %v259_v6 = vld [vmem:[%s3181_s13 + $0x41] sm:$0xff]  ;;  %v872_v12 = vld [vmem:[%s3181_s13 + $0x2a] sm:$0xff] }
  0x25   : > { %v296_v8 = vpack.c.bf16 %v270_v3, %v269_v2  ;;  %v291_v10 = vpack.c.bf16 %v260_v7, %v259_v6  ;;  %v871_v11 = vld [vmem:[%s3181_s13 + $0x22] sm:$0xff]  ;;  %v622_v17 = vld [vmem:[%s3181_s13 + $0xa] sm:$0xff]  ;;  %v1117_v18 = vld [vmem:[%s3181_s13 + $0x13] sm:$0xff] }
  0x26   : > { %v906_v13 = vpack.c.bf16 %v872_v12, %v871_v11  ;;  %v196_v14 = vld [vmem:[%s3181_s13] sm:$0xff]  ;;  %v197_v15 = vld [vmem:[%s3181_s13 + $0x8] sm:$0xff]  ;;  %v873_v23 = vld [vmem:[%s3181_s13 + $0x32] sm:$0xff] }
  0x27   : > { %v621_v16 = vld [vmem:[%s3181_s13 + $0x2] sm:$0xff]  ;;  %v232_v20 = vpack.c.bf16 %v197_v15, %v196_v14  ;;  %v874_v24 = vld [vmem:[%s3181_s13 + $0x3a] sm:$0xff]  ;;  %v198_v26 = vld [vmem:[%s3181_s13 + $0x10] sm:$0xff] }
  0x28   : > { %v1118_v19 = vld [vmem:[%s3181_s13 + $0x1b] sm:$0xff]  ;;  %v657_v21 = vpack.c.bf16 %v622_v17, %v621_v16  ;;  %v907_v25 = vpack.c.bf16 %v874_v24, %v873_v23  ;;  %v201_v36 = vld [vmem:[%s3181_s13 + $0x28] sm:$0xff]  ;;  %v1121_v37 = vld [vmem:[%s3181_s13 + $0x33] sm:$0xff] }
  0x29   : > { %v1153_v22 = vpack.c.bf16 %v1118_v19, %v1117_v18  ;;  %v199_v27 = vld [vmem:[%s3181_s13 + $0x18] sm:$0xff]  ;;  %v875_v32 = vld [vmem:[%s3181_s13 + $0x42] sm:$0xff]  ;;  %v202_v44 = vld [vmem:[%s3181_s13 + $0x30] sm:$0xff] }
  0x2a   : > { %v200_v35 = vld [vmem:[%s3181_s13 + $0x20] sm:$0xff]  ;;  %v1124_v47 = vld [vmem:[%s3181_s13 + $0x4b] sm:$0xff]  ;;  %v1125_v61 = vld [vmem:[%s3181_s13 + $0x53] sm:$0xff] }
  0x2b   : > { %2808 = vmatmul.msk.bf16.gmra.mxu1 %vm307_vm1, %v293_v28  ;;  %v1119_v28 = vld [vmem:[%s3181_s13 + $0x23] sm:$0xff]  ;;  %v1122_v38 = vld [vmem:[%s3181_s13 + $0x3b] sm:$0xff]  ;;  %v234_v39 = vpack.c.bf16 %v201_v36, %v200_v35  ;;  %v881_v3 = vld [vmem:[%s3181_s13 + $0x72] sm:$0xff] }
  0x2c   : > { %2813 = vmatmul.msk.bf16.gmra.mxu2 %vm307_vm1, %v298_v29  ;;  %v1120_v29 = vld [vmem:[%s3181_s13 + $0x2b] sm:$0xff]  ;;  %v1123_v46 = vld [vmem:[%s3181_s13 + $0x43] sm:$0xff]  ;;  %v1126_v62 = vld [vmem:[%s3181_s13 + $0x5b] sm:$0xff] }
  0x2d   : > { %2803 = vmatmul.msk.bf16.gmra.mxu0 %vm307_vm1, %v288_v30  ;;  %2818 = vmatmul.msk.bf16.gmra.mxu3 %vm307_vm1, %v303_v33  ;;  %v233_v30 = vpack.c.bf16 %v199_v27, %v198_v26  ;;  %v1154_v31 = vpack.c.bf16 %v1120_v29, %v1119_v28  ;;  %v876_v33 = vld [vmem:[%s3181_s13 + $0x4a] sm:$0xff]  ;;  %v1156_v50 = vpack.c.bf16 %v1124_v47, %v1123_v46  ;;  %v879_v51 = vld [vmem:[%s3181_s13 + $0x62] sm:$0xff]  ;;  %v882_v4 = vld [vmem:[%s3181_s13 + $0x7a] sm:$0xff] }
  0x2e   : > { %v908_v34 = vpack.c.bf16 %v876_v33, %v875_v32  ;;  %v204_v59 = vld [vmem:[%s3181_s13 + $0x40] sm:$0xff]  ;;  %v205_v60 = vld [vmem:[%s3181_s13 + $0x48] sm:$0xff]  ;;  %v1157_v2 = vpack.c.bf16 %v1126_v62, %v1125_v61  ;;  %v3335_v7 = vpack.c.bf16 %v882_v4, %v881_v3  ;;  %v206_v12 = vld [vmem:[%s3181_s13 + $0x50] sm:$0xff] }
  0x2f   : > { %v236_v0 = vpack.c.bf16 %v205_v60, %v204_v59  ;;  %v1127_v14 = vld [vmem:[%s3181_s13 + $0x63] sm:$0xff]  ;;  %v1128_v15 = vld [vmem:[%s3181_s13 + $0x6b] sm:$0xff]  ;;  %v1130_v32 = vld [vmem:[%s3181_s13 + $0x7b] sm:$0xff] }
  0x30   : > { %v1158_v19 = vpack.c.bf16 %v1128_v15, %v1127_v14  ;;  %v208_v29 = vld [vmem:[%s3181_s13 + $0x60] sm:$0xff]  ;;  %v210_v46 = vld [vmem:[%s3181_s13 + $0x70] sm:$0xff]  ;;  %v211_v47 = vld [vmem:[%s3181_s13 + $0x78] sm:$0xff] }
  0x31   : > { %v887_v60 = vld [vmem:[%s3181_s13 + $0xa2] sm:$0xff]  ;;  %v888_v61 = vld [vmem:[%s3181_s13 + $0xaa] sm:$0xff] }
  0x32   : > { %v212_v14 = vld [vmem:[%s3181_s13 + $0x80] sm:$0xff]  ;;  %v213_v15 = vld [vmem:[%s3181_s13 + $0x88] sm:$0xff] }
  0x3b   : > { %2809 = vmatmul.msk.bf16.gmra.mxu1 %vm307_vm1, %v294_v40  ;;  %v1155_v40 = vpack.c.bf16 %v1122_v38, %v1121_v37  ;;  %v885_v37 = vld [vmem:[%s3181_s13 + $0x92] sm:$0xff]  ;;  %v886_v38 = vld [vmem:[%s3181_s13 + $0x9a] sm:$0xff] }
  0x3c   : > { %2814 = vmatmul.msk.bf16.gmra.mxu2 %vm307_vm1, %v299_v41  ;;  %v877_v41 = vld [vmem:[%s3181_s13 + $0x52] sm:$0xff] }
  0x3d   : > { %2804 = vmatmul.msk.bf16.gmra.mxu0 %vm307_vm1, %v289_v42  ;;  %2819 = vmatmul.msk.bf16.gmra.mxu3 %vm307_vm1, %v304_v45  ;;  %v878_v42 = vld [vmem:[%s3181_s13 + $0x5a] sm:$0xff] }
  0x3e   : > { %v909_v43 = vpack.c.bf16 %v878_v42, %v877_v41  ;;  %v203_v45 = vld [vmem:[%s3181_s13 + $0x38] sm:$0xff]  ;;  %v3393_v41 = vpack.c.bf16 %v886_v38, %v885_v37 }
  0x3f   : > { %v235_v48 = vpack.c.bf16 %v203_v45, %v202_v44 }
  0x4b   : > { %2810 = vmatmul.msk.bf16.gmra.mxu1 %vm307_vm1, %v295_v52  ;;  %v880_v52 = vld [vmem:[%s3181_s13 + $0x6a] sm:$0xff] }
  0x4c   : > { %2815 = vmatmul.msk.bf16.gmra.mxu2 %vm307_vm1, %v300_v53 }
  0x4d   : > { %2805 = vmatmul.msk.bf16.gmra.mxu0 %vm307_vm1, %v290_v54  ;;  %2858 = vmatmul.msk.bf16.vlgmr.msrb.gmra.mxu3 %vm307_vm1, %v905_v57  ;;  %v3306_v54 = vpack.c.bf16 %v880_v52, %v879_v51  ;;  %v239_v52 = vpack.c.bf16 %v211_v47, %v210_v46 }
  0x5b   : > { %2811 = vmatmul.msk.bf16.gmra.mxu1 %vm307_vm1, %v296_v8 }
  0x5c   : > { %2816 = vmatmul.msk.bf16.gmra.mxu2 %vm307_vm1, %v301_v9 }
  0x5d   : > { %2806 = vmatmul.msk.bf16.gmra.mxu0 %vm307_vm1, %v291_v10  ;;  %2859 = vmatmul.msk.bf16.gmra.mxu3 %vm307_vm1, %v906_v13 }
  0x6b   : > { %2820 = vmatmul.msk.bf16.vlgmr.msrb.gmra.mxu1 %vm307_vm1, %v232_v20  ;;  %v883_v20 = vld [vmem:[%s3181_s13 + $0x82] sm:$0xff] }
  0x6c   : > { %2839 = vmatmul.msk.bf16.vlgmr.msrb.gmra.mxu2 %vm307_vm1, %v657_v21  ;;  %v884_v21 = vld [vmem:[%s3181_s13 + $0x8a] sm:$0xff] }
  0x6d   : > { %2877 = vmatmul.msk.bf16.vlgmr.msrb.gmra.mxu0 %vm307_vm1, %v1153_v22  ;;  %2860 = vmatmul.msk.bf16.gmra.mxu3 %vm307_vm1, %v907_v25  ;;  %v3364_v24 = vpack.c.bf16 %v884_v21, %v883_v20 }
  0x7b   : > { %2821 = vmatmul.msk.bf16.gmra.mxu1 %vm307_vm1, %v233_v30  ;;  %v209_v30 = vld [vmem:[%s3181_s13 + $0x68] sm:$0xff] }
  0x7c   : > { %2840 = vmatmul.msk.bf16.gmra.mxu2 %vm307_vm1, %v905_v57 }
  0x7d   : > { %2878 = vmatmul.msk.bf16.gmra.mxu0 %vm307_vm1, %v1154_v31  ;;  %2861 = vmatmul.msk.bf16.gmra.mxu3 %vm307_vm1, %v908_v34  ;;  %v1129_v31 = vld [vmem:[%s3181_s13 + $0x73] sm:$0xff] }
  0x7e   : > { %v1159_v36 = vpack.c.bf16 %v1130_v32, %v1129_v31  ;;  %v890_v31 = vld [vmem:[%s3181_s13 + $0xba] sm:$0xff] }
  0x8b   : > { %2822 = vmatmul.msk.bf16.gmra.mxu1 %vm307_vm1, %v234_v39 }
  0x8c   : > { %2841 = vmatmul.msk.bf16.gmra.mxu2 %vm307_vm1, %v906_v13  ;;  %v207_v13 = vld [vmem:[%s3181_s13 + $0x58] sm:$0xff] }
  0x8d   : > { %2879 = vmatmul.msk.bf16.gmra.mxu0 %vm307_vm1, %v1155_v40  ;;  %2862 = vmatmul.msk.bf16.gmra.mxu3 %vm307_vm1, %v909_v43  ;;  %v237_v17 = vpack.c.bf16 %v207_v13, %v206_v12 }
  0x98   : > { %v3299_v49 = vpop.f32.mrf.mxu1 }
  0x9a   : > { %v3303_v53 = vpop.f32.mrf.mxu0 }
  0x9b   : > { %2823 = vmatmul.msk.bf16.gmra.mxu1 %vm307_vm1, %v235_v48  ;;  %v1131_v48 = vld [vmem:[%s3181_s13 + $0x83] sm:$0xff] }
  0x9c   : > { %2842 = vmatmul.msk.bf16.gmra.mxu2 %vm307_vm1, %v907_v25 }
  0x9d   : > { %2880 = vmatmul.msk.bf16.gmra.mxu0 %vm307_vm1, %v1156_v50  ;;  %2863 = vmatmul.msk.bf16.gmra.mxu3 %vm307_vm1, %v3306_v54  ;;  %v1132_v50 = vld [vmem:[%s3181_s13 + $0x8b] sm:$0xff] }
  0x9e   : > { %v1160_v59 = vpack.c.bf16 %v1132_v50, %v1131_v48 }
  0x9f   : > { %v3310_v55 = vpop.f32.mrf.mxu2 }
  0xa0   : > { %v3314_v56 = vpop.f32.mrf.mxu1  ;;  %v3318_v58 = vpop.f32.mrf.mxu3 }
  0xa2   : > { %v3316_v57 = vpop.f32.mrf.mxu0 }
  0xa7   : > { %v3324_v63 = vpop.f32.mrf.mxu2 }
  0xa8   : > { %v3326_v1 = vpop.f32.mrf.mxu1  ;;  %v3332_v6 = vpop.f32.mrf.mxu3 }
  0xaa   : > { %v3330_v5 = vpop.f32.mrf.mxu0 }
  0xab   : > { %2824 = vmatmul.msk.bf16.gmra.mxu1 %vm307_vm1, %v236_v0 }
  0xac   : > { %2843 = vmatmul.msk.bf16.gmra.mxu2 %vm307_vm1, %v908_v34  ;;  %v238_v34 = vpack.c.bf16 %v209_v30, %v208_v29  ;;  %v889_v30 = vld [vmem:[%s3181_s13 + $0xb2] sm:$0xff] }
  0xad   : > { %2881 = vmatmul.msk.bf16.gmra.mxu0 %vm307_vm1, %v1157_v2  ;;  %2864 = vmatmul.msk.bf16.gmra.mxu3 %vm307_vm1, %v3335_v7  ;;  %v3419_v2 = vpack.c.bf16 %v888_v61, %v887_v60  ;;  %v215_v60 = vld [vmem:[%s3181_s13 + $0x98] sm:$0xff] }
  0xaf   : > { %v3339_v8 = vpop.f32.mrf.mxu2 }
  0xb0   : > { %v3343_v9 = vpop.f32.mrf.mxu1  ;;  %v3347_v11 = vpop.f32.mrf.mxu3 }
  0xb2   : > { %v3345_v10 = vpop.f32.mrf.mxu0 }
  0xb7   : > { %v3353_v16 = vpop.f32.mrf.mxu2 }
  0xb8   : > { %v3355_v18 = vpop.f32.mrf.mxu1  ;;  %v3361_v23 = vpop.f32.mrf.mxu3 }
  0xba   : > { %v3359_v22 = vpop.f32.mrf.mxu0 }
  0xbb   : > { %2825 = vmatmul.msk.bf16.gmra.mxu1 %vm307_vm1, %v237_v17  ;;  %v1133_v17 = vld [vmem:[%s3181_s13 + $0x93] sm:$0xff] }
  0xbc   : > { %2844 = vmatmul.msk.bf16.gmra.mxu2 %vm307_vm1, %v909_v43 }
  0xbd   : > { %2882 = vmatmul.msk.bf16.gmra.mxu0 %vm307_vm1, %v1158_v19  ;;  %2865 = vmatmul.msk.bf16.gmra.mxu3 %vm307_vm1, %v3364_v24  ;;  %v1134_v19 = vld [vmem:[%s3181_s13 + $0x9b] sm:$0xff] }
  0xbe   : > { %v1161_v29 = vpack.c.bf16 %v1134_v19, %v1133_v17 }
  0xbf   : > { %v3368_v25 = vpop.f32.mrf.mxu2 }
  0xc0   : > { %v3372_v26 = vpop.f32.mrf.mxu1  ;;  %v3376_v28 = vpop.f32.mrf.mxu3 }
  0xc2   : > { %v3374_v27 = vpop.f32.mrf.mxu0 }
  0xc7   : > { %v3382_v33 = vpop.f32.mrf.mxu2 }
  0xc8   : > { %v3384_v35 = vpop.f32.mrf.mxu1  ;;  %v3390_v40 = vpop.f32.mrf.mxu3 }
  0xca   : > { %v3388_v39 = vpop.f32.mrf.mxu0 }
  0xcb   : > { %2826 = vmatmul.msk.bf16.gmra.mxu1 %vm307_vm1, %v238_v34 }
  0xcc   : > { %2845 = vmatmul.msk.bf16.gmra.mxu2 %vm307_vm1, %v3306_v54 }
  0xcd   : > { %2883 = vmatmul.msk.bf16.gmra.mxu0 %vm307_vm1, %v1159_v36  ;;  %2866 = vmatmul.msk.bf16.gmra.mxu3 %vm307_vm1, %v3393_v41  ;;  %v3441_v36 = vpack.c.bf16 %v890_v31, %v889_v30  ;;  %v892_v30 = vld [vmem:[%s3181_s13 + $0xca] sm:$0xff] }
  0xcf   : > { %v3398_v42 = vpop.f32.mrf.mxu2 }
  0xd0   : > { %v3402_v43 = vpop.f32.mrf.mxu1  ;;  %v991_v45 = vpop.f32.mrf.mxu3 }
  0xd2   : > { %v3404_v44 = vpop.f32.mrf.mxu0 }
  0xd7   : > { %v3410_v51 = vpop.f32.mrf.mxu2 }
  0xd8   : > { %v3412_v54 = vpop.f32.mrf.mxu1  ;;  %v993_v0 = vpop.f32.mrf.mxu3 }
  0xda   : > { %v3416_v62 = vpop.f32.mrf.mxu0 }
  0xdb   : > { %2827 = vmatmul.msk.bf16.gmra.mxu1 %vm307_vm1, %v239_v52 }
  0xdc   : > { %2846 = vmatmul.msk.bf16.gmra.mxu2 %vm307_vm1, %v3335_v7  ;;  %v240_v7 = vpack.c.bf16 %v213_v15, %v212_v14  ;;  %v1136_v14 = vld [vmem:[%s3181_s13 + $0xab] sm:$0xff] }
  0xdd   : > { %2884 = vmatmul.msk.bf16.gmra.mxu0 %vm307_vm1, %v1160_v59  ;;  %2867 = vmatmul.msk.bf16.gmra.mxu3 %vm307_vm1, %v3419_v2  ;;  %v214_v59 = vld [vmem:[%s3181_s13 + $0x90] sm:$0xff] }
  0xde   : > { %v241_v17 = vpack.c.bf16 %v215_v60, %v214_v59 }
  0xdf   : > { %v3424_v3 = vpop.f32.mrf.mxu2 }
  0xe0   : > { %v3428_v4 = vpop.f32.mrf.mxu1  ;;  %v996_v13 = vpop.f32.mrf.mxu3 }
  0xe2   : > { %v3430_v12 = vpop.f32.mrf.mxu0 }
  0xe7   : > { %v3436_v20 = vpop.f32.mrf.mxu2 }
  0xe8   : > { %v531_v21 = vpop.f32.mrf.mxu1  ;;  %v998_v34 = vpop.f32.mrf.mxu3 }
  0xe9   : > { %v532_v37 = vadd.f32 %v531_v21, %v3303_v53 }
  0xea   : > { %v1239_v32 = vpop.f32.mrf.mxu0 }
  0xeb   : > { %2828 = vmatmul.msk.bf16.gmra.mxu1 %vm307_vm1, %v240_v7 }
  0xec   : > { %2847 = vmatmul.msk.bf16.gmra.mxu2 %vm307_vm1, %v3364_v24  ;;  %v1135_v24 = vld [vmem:[%s3181_s13 + $0xa3] sm:$0xff] }
  0xed   : > { %2885 = vmatmul.msk.bf16.gmra.mxu0 %vm307_vm1, %v1161_v29  ;;  %2868 = vmatmul.msk.bf16.gmra.mxu3 %vm307_vm1, %v3441_v36  ;;  %v1162_v21 = vpack.c.bf16 %v1136_v14, %v1135_v24  ;;  %v891_v29 = vld [vmem:[%s3181_s13 + $0xc2] sm:$0xff] }
  0xee   : > { %v216_v24 = vld [vmem:[%s3181_s13 + $0xa0] sm:$0xff]  ;;  %v217_v14 = vld [vmem:[%s3181_s13 + $0xa8] sm:$0xff] }
  0xef   : > { %v743_v38 = vpop.f32.mrf.mxu2 }
  0xf0   : > { %v833_v46 = vadd.f32 %v743_v38, %v532_v37  ;;  %v533_v47 = vpop.f32.mrf.mxu1  ;;  %v1001_v52 = vpop.f32.mrf.mxu3 }
  0xf1   : > { %v534_v15 = vadd.f32 %v533_v47, %v3316_v57 }
  0xf2   : > { %v1241_v48 = vpop.f32.mrf.mxu0  ;;  %v1081_v50 = vadd.f32 %v991_v45, %v833_v46 }
  0xf4   : > { %v3451_v61 = vadd.f32 %v1239_v32, %v1081_v50  ;;  %v3459_v32 = vpack.c.bf16 %v892_v30, %v891_v29  ;;  %v893_v29 = vld [vmem:[%s3181_s13 + $0xd2] sm:$0xff]  ;;  %v894_v30 = vld [vmem:[%s3181_s13 + $0xda] sm:$0xff] }
  0xf7   : > { %v745_v53 = vpop.f32.mrf.mxu2 }
  0xf8   : > { %v834_v19 = vadd.f32 %v745_v53, %v534_v15  ;;  %v536_v7 = vpop.f32.mrf.mxu1  ;;  %v1003_v45 = vpop.f32.mrf.mxu3  ;;  %v1137_v15 = vld [vmem:[%s3181_s13 + $0xb3] sm:$0xff] }
  0xf9   : > { %v537_v38 = vadd.f32 %v536_v7, %v3330_v5 }
  0xfa   : > { %v1244_v31 = vpop.f32.mrf.mxu0  ;;  %v1082_v37 = vadd.f32 %v993_v0, %v834_v19 }
  0xfb   : > { %2829 = vmatmul.msk.bf16.gmra.mxu1 %vm307_vm1, %v241_v17  ;;  %v242_v17 = vpack.c.bf16 %v217_v14, %v216_v24 }
  0xfc   : > { %2848 = vmatmul.msk.bf16.gmra.mxu2 %vm307_vm1, %v3393_v41  ;;  %v3464_v57 = vadd.f32 %v1241_v48, %v1082_v37  ;;  %v1138_v48 = vld [vmem:[%s3181_s13 + $0xbb] sm:$0xff] }
  0xfd   : > { %2886 = vmatmul.msk.bf16.gmra.mxu0 %vm307_vm1, %v1162_v21  ;;  %2869 = vmatmul.msk.bf16.gmra.mxu3 %vm307_vm1, %v3459_v32  ;;  %v1163_v21 = vpack.c.bf16 %v1138_v48, %v1137_v15  ;;  %v218_v15 = vld [vmem:[%s3181_s13 + $0xb0] sm:$0xff]  ;;  %v219_v48 = vld [vmem:[%s3181_s13 + $0xb8] sm:$0xff] }
  0xff   : > { %v748_v46 = vpop.f32.mrf.mxu2 }
 0x100   : > { %v835_v0 = vadd.f32 %v748_v46, %v537_v38  ;;  %v538_v47 = vpop.f32.mrf.mxu1  ;;  %v1006_v60 = vpop.f32.mrf.mxu3 }
 0x101   : > { %v539_v53 = vadd.f32 %v538_v47, %v3345_v10 }
 0x102   : > { %v1246_v50 = vpop.f32.mrf.mxu0  ;;  %v1083_v59 = vadd.f32 %v996_v13, %v835_v0 }
 0x104   : > { %v3471_v41 = vadd.f32 %v1244_v31, %v1083_v59  ;;  %v3479_v31 = vpack.c.bf16 %v894_v30, %v893_v29  ;;  %v895_v29 = vld [vmem:[%s3181_s13 + $0xe2] sm:$0xff]  ;;  %v896_v30 = vld [vmem:[%s3181_s13 + $0xea] sm:$0xff] }
 0x107   : > { %v750_v5 = vpop.f32.mrf.mxu2 }
 0x108   : > { %v836_v19 = vadd.f32 %v750_v5, %v539_v53  ;;  %v541_v7 = vpop.f32.mrf.mxu1  ;;  %v1008_v13 = vpop.f32.mrf.mxu3  ;;  %v1139_v53 = vld [vmem:[%s3181_s13 + $0xc3] sm:$0xff] }
 0x109   : > { %v542_v46 = vadd.f32 %v541_v7, %v3359_v22 }
 0x10a   : > { %v1249_v37 = vpop.f32.mrf.mxu0  ;;  %v1084_v38 = vadd.f32 %v998_v34, %v836_v19 }
 0x10b   : > { %2830 = vmatmul.msk.bf16.gmra.mxu1 %vm307_vm1, %v242_v17  ;;  %v243_v17 = vpack.c.bf16 %v219_v48, %v218_v15 }
 0x10c   : > { %2849 = vmatmul.msk.bf16.gmra.mxu2 %vm307_vm1, %v3419_v2  ;;  %v3484_v10 = vadd.f32 %v1246_v50, %v1084_v38  ;;  %v1140_v50 = vld [vmem:[%s3181_s13 + $0xcb] sm:$0xff] }
 0x10d   : > { %2887 = vmatmul.msk.bf16.gmra.mxu0 %vm307_vm1, %v1163_v21  ;;  %2870 = vmatmul.msk.bf16.gmra.mxu3 %vm307_vm1, %v3479_v31  ;;  %v1164_v21 = vpack.c.bf16 %v1140_v50, %v1139_v53  ;;  %v220_v53 = vld [vmem:[%s3181_s13 + $0xc0] sm:$0xff]  ;;  %v221_v50 = vld [vmem:[%s3181_s13 + $0xc8] sm:$0xff] }
 0x10f   : > { %v753_v0 = vpop.f32.mrf.mxu2 }
 0x110   : > { %v837_v34 = vadd.f32 %v753_v0, %v542_v46  ;;  %v543_v47 = vpop.f32.mrf.mxu1  ;;  %v1011_v14 = vpop.f32.mrf.mxu3 }
 0x111   : > { %v544_v5 = vadd.f32 %v543_v47, %v3374_v27 }
 0x112   : > { %v1251_v59 = vpop.f32.mrf.mxu0  ;;  %v1085_v24 = vadd.f32 %v1001_v52, %v837_v34 }
 0x114   : > { %v3491_v2 = vadd.f32 %v1249_v37, %v1085_v24  ;;  %v3499_v37 = vpack.c.bf16 %v896_v30, %v895_v29  ;;  %v897_v29 = vld [vmem:[%s3181_s13 + $0xf2] sm:$0xff]  ;;  %v898_v30 = vld [vmem:[%s3181_s13 + $0xfa] sm:$0xff] }
 0x117   : > { %v755_v22 = vpop.f32.mrf.mxu2 }
 0x118   : > { %v838_v19 = vadd.f32 %v755_v22, %v544_v5  ;;  %v546_v7 = vpop.f32.mrf.mxu1  ;;  %v1013_v52 = vpop.f32.mrf.mxu3  ;;  %v1141_v5 = vld [vmem:[%s3181_s13 + $0xd3] sm:$0xff] }
 0x119   : > { %v547_v0 = vadd.f32 %v546_v7, %v3388_v39 }
 0x11a   : > { %v1254_v38 = vpop.f32.mrf.mxu0  ;;  %v1086_v46 = vadd.f32 %v1003_v45, %v838_v19 }
 0x11b   : > { %2831 = vmatmul.msk.bf16.gmra.mxu1 %vm307_vm1, %v243_v17  ;;  %v244_v17 = vpack.c.bf16 %v221_v50, %v220_v53 }
 0x11c   : > { %2850 = vmatmul.msk.bf16.gmra.mxu2 %vm307_vm1, %v3441_v36  ;;  %v3504_v27 = vadd.f32 %v1251_v59, %v1086_v46  ;;  %v1142_v59 = vld [vmem:[%s3181_s13 + $0xdb] sm:$0xff] }
 0x11d   : > { %2888 = vmatmul.msk.bf16.gmra.mxu0 %vm307_vm1, %v1164_v21  ;;  %2871 = vmatmul.msk.bf16.gmra.mxu3 %vm307_vm1, %v3499_v37  ;;  %v1165_v21 = vpack.c.bf16 %v1142_v59, %v1141_v5  ;;  %v222_v5 = vld [vmem:[%s3181_s13 + $0xd0] sm:$0xff]  ;;  %v223_v59 = vld [vmem:[%s3181_s13 + $0xd8] sm:$0xff] }
 0x11f   : > { %v758_v34 = vpop.f32.mrf.mxu2 }
 0x120   : > { %v839_v45 = vadd.f32 %v758_v34, %v547_v0  ;;  %v548_v47 = vpop.f32.mrf.mxu1  ;;  %v1016_v48 = vpop.f32.mrf.mxu3 }
 0x121   : > { %v549_v22 = vadd.f32 %v548_v47, %v3404_v44 }
 0x122   : > { %v1256_v24 = vpop.f32.mrf.mxu0  ;;  %v1087_v15 = vadd.f32 %v1006_v60, %v839_v45 }
 0x124   : > { %v3511_v36 = vadd.f32 %v1254_v38, %v1087_v15  ;;  %v3519_v38 = vpack.c.bf16 %v898_v30, %v897_v29  ;;  %v899_v29 = vld [vmem:[%s3181_s13 + $0x102] sm:$0xff]  ;;  %v900_v30 = vld [vmem:[%s3181_s13 + $0x10a] sm:$0xff] }
 0x127   : > { %v760_v39 = vpop.f32.mrf.mxu2 }
 0x128   : > { %v840_v19 = vadd.f32 %v760_v39, %v549_v22  ;;  %v551_v7 = vpop.f32.mrf.mxu1  ;;  %v1018_v60 = vpop.f32.mrf.mxu3  ;;  %v1143_v22 = vld [vmem:[%s3181_s13 + $0xe3] sm:$0xff] }
 0x129   : > { %v552_v34 = vadd.f32 %v551_v7, %v3416_v62 }
 0x12a   : > { %v1259_v46 = vpop.f32.mrf.mxu0  ;;  %v1088_v0 = vadd.f32 %v1008_v13, %v840_v19 }
 0x12b   : > { %2832 = vmatmul.msk.bf16.gmra.mxu1 %vm307_vm1, %v244_v17  ;;  %v245_v17 = vpack.c.bf16 %v223_v59, %v222_v5 }
 0x12c   : > { %2851 = vmatmul.msk.bf16.gmra.mxu2 %vm307_vm1, %v3459_v32  ;;  %v3524_v44 = vadd.f32 %v1256_v24, %v1088_v0  ;;  %v1144_v24 = vld [vmem:[%s3181_s13 + $0xeb] sm:$0xff] }
 0x12d   : > { %2889 = vmatmul.msk.bf16.gmra.mxu0 %vm307_vm1, %v1165_v21  ;;  %2872 = vmatmul.msk.bf16.gmra.mxu3 %vm307_vm1, %v3519_v38  ;;  %v1166_v21 = vpack.c.bf16 %v1144_v24, %v1143_v22  ;;  %v224_v22 = vld [vmem:[%s3181_s13 + $0xe0] sm:$0xff]  ;;  %v225_v24 = vld [vmem:[%s3181_s13 + $0xe8] sm:$0xff] }
 0x12f   : > { %v763_v45 = vpop.f32.mrf.mxu2 }
 0x130   : > { %v841_v13 = vadd.f32 %v763_v45, %v552_v34  ;;  %v553_v47 = vpop.f32.mrf.mxu1  ;;  %v1021_v50 = vpop.f32.mrf.mxu3 }
 0x131   : > { %v554_v39 = vadd.f32 %v553_v47, %v3430_v12 }
 0x132   : > { %v1261_v15 = vpop.f32.mrf.mxu0  ;;  %v1089_v53 = vadd.f32 %v1011_v14, %v841_v13 }
 0x134   : > { %v3531_v32 = vadd.f32 %v1259_v46, %v1089_v53  ;;  %v3539_v46 = vpack.c.bf16 %v900_v30, %v899_v29  ;;  %v901_v29 = vld [vmem:[%s3181_s13 + $0x112] sm:$0xff]  ;;  %v902_v30 = vld [vmem:[%s3181_s13 + $0x11a] sm:$0xff] }
 0x137   : > { %v765_v62 = vpop.f32.mrf.mxu2 }
 0x138   : > { %v842_v19 = vadd.f32 %v765_v62, %v554_v39  ;;  %v556_v7 = vpop.f32.mrf.mxu1  ;;  %v1023_v14 = vpop.f32.mrf.mxu3  ;;  %v1145_v39 = vld [vmem:[%s3181_s13 + $0xf3] sm:$0xff] }
 0x139   : > { %v557_v45 = vadd.f32 %v556_v7, %v3299_v49 }
 0x13a   : > { %v1264_v0 = vpop.f32.mrf.mxu0  ;;  %v1090_v34 = vadd.f32 %v1013_v52, %v842_v19 }
 0x13b   : > { %2833 = vmatmul.msk.bf16.gmra.mxu1 %vm307_vm1, %v245_v17  ;;  %v246_v17 = vpack.c.bf16 %v225_v24, %v224_v22 }
 0x13c   : > { %2852 = vmatmul.msk.bf16.gmra.mxu2 %vm307_vm1, %v3479_v31  ;;  %v3544_v12 = vadd.f32 %v1261_v15, %v1090_v34  ;;  %v1146_v15 = vld [vmem:[%s3181_s13 + $0xfb] sm:$0xff] }
 0x13d   : > { %2890 = vmatmul.msk.bf16.gmra.mxu0 %vm307_vm1, %v1166_v21  ;;  %2873 = vmatmul.msk.bf16.gmra.mxu3 %vm307_vm1, %v3539_v46  ;;  %v1167_v21 = vpack.c.bf16 %v1146_v15, %v1145_v39  ;;  %v226_v39 = vld [vmem:[%s3181_s13 + $0xf0] sm:$0xff]  ;;  %v227_v15 = vld [vmem:[%s3181_s13 + $0xf8] sm:$0xff] }
 0x13f   : > { %v768_v13 = vpop.f32.mrf.mxu2 }
 0x140   : > { %v843_v52 = vadd.f32 %v768_v13, %v557_v45  ;;  %v558_v47 = vpop.f32.mrf.mxu1  ;;  %v1026_v59 = vpop.f32.mrf.mxu3 }
 0x141   : > { %v559_v62 = vadd.f32 %v558_v47, %v3314_v56 }
 0x142   : > { %v1266_v53 = vpop.f32.mrf.mxu0  ;;  %v1091_v5 = vadd.f32 %v1016_v48, %v843_v52 }
 0x144   : > { %v3551_v31 = vadd.f32 %v1264_v0, %v1091_v5  ;;  %v3559_v0 = vpack.c.bf16 %v902_v30, %v901_v29  ;;  %v903_v29 = vld [vmem:[%s3181_s13 + $0x122] sm:$0xff]  ;;  %v904_v30 = vld [vmem:[%s3181_s13 + $0x12a] sm:$0xff] }
 0x147   : > { %v770_v49 = vpop.f32.mrf.mxu2 }
 0x148   : > { %v844_v19 = vadd.f32 %v770_v49, %v559_v62  ;;  %v561_v7 = vpop.f32.mrf.mxu1  ;;  %v1028_v48 = vpop.f32.mrf.mxu3  ;;  %v1147_v62 = vld [vmem:[%s3181_s13 + $0x103] sm:$0xff] }
 0x149   : > { %v562_v13 = vadd.f32 %v561_v7, %v3326_v1 }
 0x14a   : > { %v1269_v34 = vpop.f32.mrf.mxu0  ;;  %v1092_v45 = vadd.f32 %v1018_v60, %v844_v19 }
 0x14b   : > { %2834 = vmatmul.msk.bf16.gmra.mxu1 %vm307_vm1, %v246_v17  ;;  %v247_v17 = vpack.c.bf16 %v227_v15, %v226_v39 }
 0x14c   : > { %2853 = vmatmul.msk.bf16.gmra.mxu2 %vm307_vm1, %v3499_v37  ;;  %v3564_v56 = vadd.f32 %v1266_v53, %v1092_v45  ;;  %v1148_v53 = vld [vmem:[%s3181_s13 + $0x10b] sm:$0xff] }
 0x14d   : > { %2891 = vmatmul.msk.bf16.gmra.mxu0 %vm307_vm1, %v1167_v21  ;;  %2874 = vmatmul.msk.bf16.gmra.mxu3 %vm307_vm1, %v3559_v0  ;;  %v1168_v21 = vpack.c.bf16 %v1148_v53, %v1147_v62  ;;  %v228_v62 = vld [vmem:[%s3181_s13 + $0x100] sm:$0xff]  ;;  %v229_v53 = vld [vmem:[%s3181_s13 + $0x108] sm:$0xff] }
 0x14f   : > { %v773_v52 = vpop.f32.mrf.mxu2 }
 0x150   : > { %v845_v60 = vadd.f32 %v773_v52, %v562_v13  ;;  %v563_v47 = vpop.f32.mrf.mxu1  ;;  %v1031_v24 = vpop.f32.mrf.mxu3 }
 0x151   : > { %v564_v49 = vadd.f32 %v563_v47, %v3343_v9 }
 0x152   : > { %v1271_v5 = vpop.f32.mrf.mxu0  ;;  %v1093_v22 = vadd.f32 %v1021_v50, %v845_v60 }
 0x154   : > { %v3571_v37 = vadd.f32 %v1269_v34, %v1093_v22  ;;  %v922_v34 = vpack.c.bf16 %v904_v30, %v903_v29  ;;  %v1861_v29 = vld [vmem:[%s3181_s13 + $0x25] sm:$0xff]  ;;  %v1862_v30 = vld [vmem:[%s3181_s13 + $0x2d] sm:$0xff] }
 0x157   : > { %v775_v1 = vpop.f32.mrf.mxu2 }
 0x158   : > { %v846_v19 = vadd.f32 %v775_v1, %v564_v49  ;;  %v566_v7 = vpop.f32.mrf.mxu1  ;;  %v1033_v50 = vpop.f32.mrf.mxu3  ;;  %v1150_v1 = vld [vmem:[%s3181_s13 + $0x11b] sm:$0xff] }
 0x159   : > { %v567_v52 = vadd.f32 %v566_v7, %v3355_v18  ;;  %v248_v18 = vpack.c.bf16 %v229_v53, %v228_v62  ;;  %v230_v53 = vld [vmem:[%s3181_s13 + $0x110] sm:$0xff] }
 0x15a   : > { %v1274_v45 = vpop.f32.mrf.mxu0  ;;  %v1094_v13 = vadd.f32 %v1023_v14, %v846_v19 }
 0x15b   : > { %2835 = vmatmul.msk.bf16.gmra.mxu1 %vm307_vm1, %v247_v17 }
 0x15c   : > { %2854 = vmatmul.msk.bf16.gmra.mxu2 %vm307_vm1, %v3519_v38  ;;  %v3582_v9 = vadd.f32 %v1271_v5, %v1094_v13  ;;  %v1149_v38 = vld [vmem:[%s3181_s13 + $0x113] sm:$0xff] }
 0x15d   : > { %2892 = vmatmul.msk.bf16.gmra.mxu0 %vm307_vm1, %v1168_v21  ;;  %2875 = vmatmul.msk.bf16.gmra.mxu3 %vm307_vm1, %v922_v34  ;;  %v1169_v21 = vpack.c.bf16 %v1150_v1, %v1149_v38  ;;  %v231_v38 = vld [vmem:[%s3181_s13 + $0x118] sm:$0xff]  ;;  %v1151_v1 = vld [vmem:[%s3181_s13 + $0x123] sm:$0xff] }
 0x15f   : > { %v778_v60 = vpop.f32.mrf.mxu2 }
 0x160   : > { %v847_v14 = vadd.f32 %v778_v60, %v567_v52  ;;  %v568_v47 = vpop.f32.mrf.mxu1  ;;  %v1036_v15 = vpop.f32.mrf.mxu3 }
 0x161   : > { %v569_v5 = vadd.f32 %v568_v47, %v3372_v26 }
 0x162   : > { %v1276_v22 = vpop.f32.mrf.mxu0  ;;  %v1095_v39 = vadd.f32 %v1026_v59, %v847_v14 }
 0x164   : > { %v3588_v49 = vadd.f32 %v1274_v45, %v1095_v39  ;;  %v1897_v45 = vpack.c.bf16 %v1862_v30, %v1861_v29  ;;  %v1864_v29 = vld [vmem:[%s3181_s13 + $0x3d] sm:$0xff] }
 0x167   : > { %v780_v17 = vpop.f32.mrf.mxu2 }
 0x168   : > { %v848_v19 = vadd.f32 %v780_v17, %v569_v5  ;;  %v571_v7 = vpop.f32.mrf.mxu1  ;;  %v3595_v59 = vpop.f32.mrf.mxu3  ;;  %v249_v17 = vpack.c.bf16 %v231_v38, %v230_v53  ;;  %v1366_v53 = vld [vmem:[%s3181_s13 + $0x1c] sm:$0xff]  ;;  %v1613_v38 = vld [vmem:[%s3181_s13 + $0x24] sm:$0xff] }
 0x169   : > { %v572_v52 = vadd.f32 %v571_v7, %v3384_v35 }
 0x16a   : > { %v1279_v13 = vpop.f32.mrf.mxu0  ;;  %v1096_v34 = vadd.f32 %v1028_v48, %v848_v19 }
 0x16b   : > { %2836 = vmatmul.msk.bf16.gmra.mxu1 %vm307_vm1, %v248_v18 }
 0x16c   : > { %2855 = vmatmul.msk.bf16.gmra.mxu2 %vm307_vm1, %v3539_v46  ;;  %v3601_v26 = vadd.f32 %v1276_v22, %v1096_v34  ;;  %v1152_v22 = vld [vmem:[%s3181_s13 + $0x12b] sm:$0xff] }
 0x16d   : > { %2893 = vmatmul.msk.bf16.gmra.mxu0 %vm307_vm1, %v1169_v21  ;;  %2934 = vmatmul.msk.bf16.vlgmr.msra.gmra.mxu3 %vm307_vm1, %v1897_v45  ;;  %v1170_v7 = vpack.c.bf16 %v1152_v22, %v1151_v1  ;;  %v1863_v21 = vld [vmem:[%s3181_s13 + $0x35] sm:$0xff]  ;;  %v1614_v22 = vld [vmem:[%s3181_s13 + $0x2c] sm:$0xff] }
 0x16e   : > { %v1898_v45 = vpack.c.bf16 %v1864_v29, %v1863_v21  ;;  %v1649_v21 = vpack.c.bf16 %v1614_v22, %v1613_v38  ;;  %v1615_v22 = vld [vmem:[%s3181_s13 + $0x34] sm:$0xff] }
 0x16f   : > { %v783_v60 = vpop.f32.mrf.mxu2 }
 0x170   : > { %v849_v48 = vadd.f32 %v783_v60, %v572_v52  ;;  %v573_v14 = vpop.f32.mrf.mxu1  ;;  %v3605_v62 = vpop.f32.mrf.mxu3 }
 0x171   : > { %v574_v5 = vadd.f32 %v573_v14, %v3402_v43 }
 0x172   : > { %v1281_v47 = vpop.f32.mrf.mxu0  ;;  %v1097_v39 = vadd.f32 %v1031_v24, %v849_v48 }
 0x174   : > { %v3609_v46 = vadd.f32 %v1279_v13, %v1097_v39 }
 0x177   : > { %v785_v35 = vpop.f32.mrf.mxu2 }
 0x178   : > { %v850_v18 = vadd.f32 %v785_v35, %v574_v5  ;;  %v576_v19 = vpop.f32.mrf.mxu1  ;;  %v3616_v24 = vpop.f32.mrf.mxu3  ;;  %v2110_v5 = vld [vmem:[%s3181_s13 + $0x2e] sm:$0xff] }
 0x179   : > { %v577_v13 = vadd.f32 %v576_v19, %v3412_v54  ;;  %v1365_v54 = vld [vmem:[%s3181_s13 + $0x14] sm:$0xff] }
 0x17a   : > { %v1284_v30 = vpop.f32.mrf.mxu0  ;;  %v1098_v34 = vadd.f32 %v1033_v50, %v850_v18  ;;  %v1401_v18 = vpack.c.bf16 %v1366_v53, %v1365_v54 }
 0x17b   : > { %2837 = vmatmul.msk.bf16.gmra.mxu1 %vm307_vm1, %v249_v17 }
 0x17c   : > { %2856 = vmatmul.msk.bf16.gmra.mxu2 %vm307_vm1, %v3559_v0  ;;  %v3622_v43 = vadd.f32 %v1281_v47, %v1098_v34  ;;  %v2433_v0 = vld [vmem:[%s4176_s3] sm:$0xff]  ;;  %v3086_v47 = vmov 0  }
 0x17d   : > { %2894 = vmatmul.msk.bf16.gmra.mxu0 %vm307_vm1, %v1170_v7  ;;  %2935 = vmatmul.msk.bf16.gmra.mxu3 %vm307_vm1, %v1898_v45  ;;  %v1865_v34 = vld [vmem:[%s3181_s13 + $0x45] sm:$0xff]  ;;  %v1866_v45 = vld [vmem:[%s3181_s13 + $0x4d] sm:$0xff] }
 0x17e   : > { %3017 = vset.pattern.permute.xlu0 %v3086_v47  ;;  %3018 = vset.pattern.permute.xlu1 %v3086_v47 }
 0x17f   : > { %v788_v52 = vpop.f32.mrf.mxu2  ;;  %2471 = vperm.xlu0 %3017, %v2433_v0   ;;  %3019 = vset.pattern.permute.xlu2 %v3086_v47 }
 0x180   : > { %v851_v50 = vadd.f32 %v788_v52, %v577_v13  ;;  %v578_v60 = vpop.f32.mrf.mxu1  ;;  %v3626_v39 = vpop.f32.mrf.mxu3 }
 0x181   : > { %v579_v35 = vadd.f32 %v578_v60, %v3428_v4  ;;  %v2434_v4 = vld [vmem:[%s4176_s3 + $0x8] sm:$0xff] }
 0x182   : > { %v1286_v48 = vpop.f32.mrf.mxu0  ;;  %v1099_v14 = vadd.f32 %v1036_v15, %v851_v50  ;;  %v2109_v15 = vld [vmem:[%s3181_s13 + $0x26] sm:$0xff] }
 0x183   : > { %v2145_v29 = vpack.c.bf16 %v2110_v5, %v2109_v15  ;;  %v2111_v5 = vld [vmem:[%s3181_s13 + $0x36] sm:$0xff] }
 0x184   : > { %v3634_v1 = vadd.f32 %v1284_v30, %v1099_v14  ;;  %v1899_v30 = vpack.c.bf16 %v1866_v45, %v1865_v34  ;;  %v1867_v34 = vld [vmem:[%s3181_s13 + $0x55] sm:$0xff]  ;;  %v1868_v45 = vld [vmem:[%s3181_s13 + $0x5d] sm:$0xff] }
 0x187   : > { %v790_v17 = vpop.f32.mrf.mxu2  ;;  %2476 = vperm.xlu0 %3017, %v2434_v4  }
 0x188   : > { %v852_v19 = vadd.f32 %v790_v17, %v579_v35  ;;  %v581_v7 = vpop.f32.mrf.mxu1  ;;  %v3643_v50 = vpop.f32.mrf.mxu3  ;;  %v2112_v35 = vld [vmem:[%s3181_s13 + $0x3e] sm:$0xff] }
 0x18a   : > { %v1289_v13 = vpop.f32.mrf.mxu0  ;;  %v1100_v52 = vadd.f32 %v3595_v59, %v852_v19  ;;  %v582_v59 = vadd.f32 %v581_v7, %v3310_v55  ;;  %v1616_v55 = vld [vmem:[%s3181_s13 + $0x3c] sm:$0xff] }
 0x18b   : > { %2896 = vmatmul.msk.bf16.vlgmr.msra.gmra.mxu1 %vm307_vm1, %v1401_v18 }
 0x18c   : > { %2915 = vmatmul.msk.bf16.vlgmr.msra.gmra.mxu2 %vm307_vm1, %v1649_v21  ;;  %v3651_v60 = vadd.f32 %v1286_v48, %v1100_v52  ;;  %v2435_v48 = vld [vmem:[%s4176_s3 + $0x10] sm:$0xff] }
 0x18d   : > { %2953 = vmatmul.msk.bf16.vlgmr.msra.gmra.mxu0 %vm307_vm1, %v2145_v29  ;;  %2936 = vmatmul.msk.bf16.gmra.mxu3 %vm307_vm1, %v1899_v30  ;;  %v1650_v29 = vpack.c.bf16 %v1616_v55, %v1615_v22  ;;  %v1617_v22 = vld [vmem:[%s3181_s13 + $0x44] sm:$0xff] }
 0x18e   : > { %2481 = vperm.xlu1 %3018, %v2435_v48  }
 0x18f   : > { %v793_v14 = vpop.f32.mrf.mxu2 }
 0x190   : > { %v853_v0 = vadd.f32 %v793_v14, %v582_v59  ;;  %v583_v47 = vpop.f32.mrf.mxu1  ;;  %v1051_v38 = vpop.f32.mrf.mxu3 }
 0x191   : > { %v584_v17 = vadd.f32 %v583_v47, %v3324_v63  ;;  %v2436_v63 = vld [vmem:[%s4176_s3 + $0x18] sm:$0xff] }
 0x192   : > { %v1291_v54 = vpop.f32.mrf.mxu0  ;;  %v1101_v53 = vadd.f32 %v3605_v62, %v853_v0  ;;  %v2146_v62 = vpack.c.bf16 %v2112_v35, %v2111_v5  ;;  %v2113_v5 = vld [vmem:[%s3181_s13 + $0x46] sm:$0xff]  ;;  %v2114_v35 = vld [vmem:[%s3181_s13 + $0x4e] sm:$0xff] }
 0x194   : > { %v3660_v15 = vadd.f32 %v1289_v13, %v1101_v53  ;;  %v1900_v13 = vpack.c.bf16 %v1868_v45, %v1867_v34  ;;  %v1869_v34 = vld [vmem:[%s3181_s13 + $0x65] sm:$0xff]  ;;  %v1870_v45 = vld [vmem:[%s3181_s13 + $0x6d] sm:$0xff] }
 0x196   : > { %2486 = vperm.xlu1 %3018, %v2436_v63  }
 0x197   : > { %v795_v18 = vpop.f32.mrf.mxu2 }
 0x198   : > { %v854_v19 = vadd.f32 %v795_v18, %v584_v17  ;;  %v586_v7 = vpop.f32.mrf.mxu1  ;;  %v1053_v4 = vpop.f32.mrf.mxu3 }
 0x19a   : > { %v1294_v52 = vpop.f32.mrf.mxu0  ;;  %v1102_v30 = vadd.f32 %v3616_v24, %v854_v19  ;;  %v587_v24 = vadd.f32 %v586_v7, %v3339_v8 }
 0x19b   : > { %2897 = vmatmul.msk.bf16.gmra.mxu1 %vm307_vm1, %v1649_v21 }
 0x19c   : > { %2916 = vmatmul.msk.bf16.gmra.mxu2 %vm307_vm1, %v1650_v29  ;;  %v3675_v59 = vadd.f32 %v1291_v54, %v1102_v30  ;;  %v1618_v54 = vld [vmem:[%s3181_s13 + $0x4c] sm:$0xff] }
 0x19d   : > { %2954 = vmatmul.msk.bf16.gmra.mxu0 %vm307_vm1, %v2146_v62  ;;  %2937 = vmatmul.msk.bf16.gmra.mxu3 %vm307_vm1, %v1900_v13  ;;  %v1651_v7 = vpack.c.bf16 %v1618_v54, %v1617_v22  ;;  %v2147_v62 = vpack.c.bf16 %v2114_v35, %v2113_v5  ;;  %v2115_v54 = vld [vmem:[%s3181_s13 + $0x56] sm:$0xff]  ;;  %v2116_v5 = vld [vmem:[%s3181_s13 + $0x5e] sm:$0xff] }
 0x19f   : > { %v798_v14 = vpop.f32.mrf.mxu2 }
 0x1a0   : > { %v855_v21 = vadd.f32 %v798_v14, %v587_v24  ;;  %v588_v0 = vpop.f32.mrf.mxu1  ;;  %v3680_v48 = vpop.f32.mrf.mxu3 }
 0x1a1   : > { %v589_v8 = vadd.f32 %v588_v0, %v3353_v16 }
 0x1a2   : > { %v1296_v47 = vpop.f32.mrf.mxu0  ;;  %v1103_v53 = vadd.f32 %v3626_v39, %v855_v21 }
 0x1a4   : > { %v3683_v55 = vadd.f32 %v1294_v52, %v1103_v53  ;;  %v1901_v52 = vpack.c.bf16 %v1870_v45, %v1869_v34  ;;  %v2439_v53 = vld [vmem:[%s4176_s3 + $0x30] sm:$0xff]  ;;  %v1872_v34 = vld [vmem:[%s3181_s13 + $0x7d] sm:$0xff] }
 0x1a5   : > { %2501 = vperm.xlu0 %3017, %v2439_v53  }
 0x1a7   : > { %v800_v17 = vpop.f32.mrf.mxu2 }
 0x1a8   : > { %v856_v18 = vadd.f32 %v800_v17, %v589_v8  ;;  %v591_v19 = vpop.f32.mrf.mxu1  ;;  %v3692_v13 = vpop.f32.mrf.mxu3 }
 0x1a9   : > { %v592_v63 = vadd.f32 %v591_v19, %v3368_v25  ;;  %v1620_v25 = vld [vmem:[%s3181_s13 + $0x5c] sm:$0xff]  ;;  %v2148_v19 = vpack.c.bf16 %v2116_v5, %v2115_v54  ;;  %v2117_v5 = vld [vmem:[%s3181_s13 + $0x66] sm:$0xff] }
 0x1aa   : > { %v1299_v30 = vpop.f32.mrf.mxu0  ;;  %v1104_v39 = vadd.f32 %v3643_v50, %v856_v18 }
 0x1ab   : > { %2898 = vmatmul.msk.bf16.gmra.mxu1 %vm307_vm1, %v1650_v29 }
 0x1ac   : > { %2917 = vmatmul.msk.bf16.gmra.mxu2 %vm307_vm1, %v1651_v7  ;;  %v3697_v16 = vadd.f32 %v1296_v47, %v1104_v39  ;;  %v1619_v47 = vld [vmem:[%s3181_s13 + $0x54] sm:$0xff] }
 0x1ad   : > { %2955 = vmatmul.msk.bf16.gmra.mxu0 %vm307_vm1, %v2147_v62  ;;  %2938 = vmatmul.msk.bf16.gmra.mxu3 %vm307_vm1, %v1901_v52  ;;  %v1871_v62 = vld [vmem:[%s3181_s13 + $0x75] sm:$0xff] }
 0x1af   : > { %v803_v24 = vpop.f32.mrf.mxu2 }
 0x1b0   : > { %v857_v50 = vadd.f32 %v803_v24, %v592_v63  ;;  %v593_v14 = vpop.f32.mrf.mxu1  ;;  %v3701_v0 = vpop.f32.mrf.mxu3  ;;  %v2440_v63 = vld [vmem:[%s4176_s3 + $0x38] sm:$0xff] }
 0x1b1   : > { %v594_v35 = vadd.f32 %v593_v14, %v3382_v33  ;;  %v2437_v33 = vld [vmem:[%s4176_s3 + $0x20] sm:$0xff]  ;;  %2506 = vperm.xlu1 %3018, %v2440_v63  }
 0x1b2   : > { %v1301_v21 = vpop.f32.mrf.mxu0  ;;  %v1105_v29 = vadd.f32 %v1051_v38, %v857_v50  ;;  %v1652_v38 = vpack.c.bf16 %v1620_v25, %v1619_v47  ;;  %2491 = vperm.xlu2 %3019, %v2437_v33   ;;  %v1621_v25 = vld [vmem:[%s3181_s13 + $0x64] sm:$0xff] }
 0x1b4   : > { %v3707_v22 = vadd.f32 %v1299_v30, %v1105_v29  ;;  %v1902_v30 = vpack.c.bf16 %v1872_v34, %v1871_v62  ;;  %v1873_v34 = vld [vmem:[%s3181_s13 + $0x85] sm:$0xff] }
 0x1b7   : > { %v805_v8 = vpop.f32.mrf.mxu2 }
 0x1b8   : > { %v858_v17 = vadd.f32 %v805_v8, %v594_v35  ;;  %v596_v18 = vpop.f32.mrf.mxu1  ;;  %v3715_v52 = vpop.f32.mrf.mxu3  ;;  %v2118_v35 = vld [vmem:[%s3181_s13 + $0x6e] sm:$0xff] }
 0x1b9   : > { %v2149_v62 = vpack.c.bf16 %v2118_v35, %v2117_v5  ;;  %v2119_v5 = vld [vmem:[%s3181_s13 + $0x76] sm:$0xff]  ;;  %v2120_v35 = vld [vmem:[%s3181_s13 + $0x7e] sm:$0xff] }
 0x1ba   : > { %v1304_v45 = vpop.f32.mrf.mxu0  ;;  %v1106_v39 = vadd.f32 %v1053_v4, %v858_v17 }
 0x1bb   : > { %2899 = vmatmul.msk.bf16.gmra.mxu1 %vm307_vm1, %v1651_v7  ;;  %v597_v7 = vadd.f32 %v596_v18, %v3398_v42  ;;  %v1622_v42 = vld [vmem:[%s3181_s13 + $0x6c] sm:$0xff] }
 0x1bc   : > { %2918 = vmatmul.msk.bf16.gmra.mxu2 %vm307_vm1, %v1652_v38  ;;  %v3726_v4 = vadd.f32 %v1301_v21, %v1106_v39  ;;  %v2438_v21 = vld [vmem:[%s4176_s3 + $0x28] sm:$0xff] }
 0x1bd   : > { %2956 = vmatmul.msk.bf16.gmra.mxu0 %vm307_vm1, %v2148_v19  ;;  %2939 = vmatmul.msk.bf16.gmra.mxu3 %vm307_vm1, %v1902_v30  ;;  %v1874_v39 = vld [vmem:[%s3181_s13 + $0x8d] sm:$0xff] }
 0x1be   : > { %2496 = vperm.xlu2 %3019, %v2438_v21  }
 0x1bf   : > { %v808_v24 = vpop.f32.mrf.mxu2 }
 0x1c0   : > { %v859_v50 = vadd.f32 %v808_v24, %v597_v7  ;;  %v598_v14 = vpop.f32.mrf.mxu1  ;;  %v3731_v47 = vpop.f32.mrf.mxu3 }
 0x1c1   : > { %v599_v8 = vadd.f32 %v598_v14, %v3410_v51  ;;  %v2442_v51 = vld [vmem:[%s4176_s3 + $0x48] sm:$0xff] }
 0x1c2   : > { %v1306_v29 = vpop.f32.mrf.mxu0  ;;  %v1107_v53 = vadd.f32 %v3680_v48, %v859_v50  ;;  %v1653_v48 = vpack.c.bf16 %v1622_v42, %v1621_v25  ;;  %2516 = vperm.xlu0 %3017, %v2442_v51   ;;  %v1623_v25 = vld [vmem:[%s3181_s13 + $0x74] sm:$0xff] }
 0x1c4   : > { %v3737_v54 = vadd.f32 %v1304_v45, %v1107_v53  ;;  %v1903_v45 = vpack.c.bf16 %v1874_v39, %v1873_v34  ;;  %v1875_v34 = vld [vmem:[%s3181_s13 + $0x95] sm:$0xff]  ;;  %v1876_v39 = vld [vmem:[%s3181_s13 + $0x9d] sm:$0xff] }
 0x1c7   : > { %v810_v17 = vpop.f32.mrf.mxu2 }
 0x1c8   : > { %v860_v18 = vadd.f32 %v810_v17, %v599_v8  ;;  %v601_v19 = vpop.f32.mrf.mxu1  ;;  %v3746_v63 = vpop.f32.mrf.mxu3 }
 0x1ca   : > { %v1309_v30 = vpop.f32.mrf.mxu0  ;;  %v1108_v33 = vadd.f32 %v3692_v13, %v860_v18  ;;  %v602_v13 = vadd.f32 %v601_v19, %v3424_v3  ;;  %v1624_v3 = vld [vmem:[%s3181_s13 + $0x7c] sm:$0xff] }
 0x1cb   : > { %2900 = vmatmul.msk.bf16.gmra.mxu1 %vm307_vm1, %v1652_v38 }
 0x1cc   : > { %2919 = vmatmul.msk.bf16.gmra.mxu2 %vm307_vm1, %v1653_v48  ;;  %v3754_v7 = vadd.f32 %v1306_v29, %v1108_v33  ;;  %v2443_v29 = vld [vmem:[%s4176_s3 + $0x50] sm:$0xff] }
 0x1cd   : > { %2957 = vmatmul.msk.bf16.gmra.mxu0 %vm307_vm1, %v2149_v62  ;;  %2940 = vmatmul.msk.bf16.gmra.mxu3 %vm307_vm1, %v1903_v45  ;;  %v2150_v62 = vpack.c.bf16 %v2120_v35, %v2119_v5  ;;  %v2121_v5 = vld [vmem:[%s3181_s13 + $0x86] sm:$0xff]  ;;  %v2122_v35 = vld [vmem:[%s3181_s13 + $0x8e] sm:$0xff] }
 0x1ce   : > { %2521 = vperm.xlu1 %3018, %v2443_v29  }
 0x1cf   : > { %v813_v24 = vpop.f32.mrf.mxu2 }
 0x1d0   : > { %v861_v38 = vadd.f32 %v813_v24, %v602_v13  ;;  %v603_v50 = vpop.f32.mrf.mxu1  ;;  %v3759_v21 = vpop.f32.mrf.mxu3 }
 0x1d1   : > { %v604_v8 = vadd.f32 %v603_v50, %v3436_v20  ;;  %v2441_v20 = vld [vmem:[%s4176_s3 + $0x40] sm:$0xff] }
 0x1d2   : > { %v1311_v14 = vpop.f32.mrf.mxu0  ;;  %v1109_v53 = vadd.f32 %v3701_v0, %v861_v38  ;;  %v1654_v0 = vpack.c.bf16 %v1624_v3, %v1623_v25  ;;  %2511 = vperm.xlu2 %3019, %v2441_v20   ;;  %v1625_v25 = vld [vmem:[%s3181_s13 + $0x84] sm:$0xff] }
 0x1d4   : > { %v3765_v42 = vadd.f32 %v1309_v30, %v1109_v53  ;;  %v1904_v30 = vpack.c.bf16 %v1876_v39, %v1875_v34  ;;  %v1877_v34 = vld [vmem:[%s3181_s13 + $0xa5] sm:$0xff]  ;;  %v1878_v39 = vld [vmem:[%s3181_s13 + $0xad] sm:$0xff] }
 0x1d7   : > { %v815_v17 = vpop.f32.mrf.mxu2 }
 0x1d8   : > { %v862_v18 = vadd.f32 %v815_v17, %v604_v8  ;;  %v606_v19 = vpop.f32.mrf.mxu1  ;;  %v3774_v51 = vpop.f32.mrf.mxu3 }
 0x1da   : > { %v1314_v33 = vpop.f32.mrf.mxu0  ;;  %v1110_v45 = vadd.f32 %v3715_v52, %v862_v18  ;;  %v607_v52 = vadd.f32 %v606_v19, %v3318_v58  ;;  %v1626_v58 = vld [vmem:[%s3181_s13 + $0x8c] sm:$0xff] }
 0x1db   : > { %2901 = vmatmul.msk.bf16.gmra.mxu1 %vm307_vm1, %v1653_v48 }
 0x1dc   : > { %2920 = vmatmul.msk.bf16.gmra.mxu2 %vm307_vm1, %v1654_v0  ;;  %v3782_v13 = vadd.f32 %v1311_v14, %v1110_v45  ;;  %v2445_v14 = vld [vmem:[%s4176_s3 + $0x60] sm:$0xff] }
 0x1dd   : > { %2958 = vmatmul.msk.bf16.gmra.mxu0 %vm307_vm1, %v2150_v62  ;;  %2941 = vmatmul.msk.bf16.gmra.mxu3 %vm307_vm1, %v1904_v30  ;;  %v2151_v62 = vpack.c.bf16 %v2122_v35, %v2121_v5  ;;  %v2123_v5 = vld [vmem:[%s3181_s13 + $0x96] sm:$0xff]  ;;  %v2124_v35 = vld [vmem:[%s3181_s13 + $0x9e] sm:$0xff] }
 0x1de   : > { %2531 = vperm.xlu0 %3017, %v2445_v14  }
 0x1df   : > { %v818_v24 = vpop.f32.mrf.mxu2 }
 0x1e0   : > { %v863_v48 = vadd.f32 %v818_v24, %v607_v52  ;;  %v608_v38 = vpop.f32.mrf.mxu1  ;;  %v3787_v29 = vpop.f32.mrf.mxu3 }
 0x1e1   : > { %v609_v8 = vadd.f32 %v608_v38, %v3332_v6  ;;  %v2446_v6 = vld [vmem:[%s4176_s3 + $0x68] sm:$0xff] }
 0x1e2   : > { %v1316_v50 = vpop.f32.mrf.mxu0  ;;  %v1111_v53 = vadd.f32 %v3731_v47, %v863_v48  ;;  %v1655_v47 = vpack.c.bf16 %v1626_v58, %v1625_v25  ;;  %2536 = vperm.xlu1 %3018, %v2446_v6   ;;  %v1627_v25 = vld [vmem:[%s3181_s13 + $0x94] sm:$0xff] }
 0x1e4   : > { %v3793_v3 = vadd.f32 %v1314_v33, %v1111_v53  ;;  %v1905_v33 = vpack.c.bf16 %v1878_v39, %v1877_v34  ;;  %v1879_v34 = vld [vmem:[%s3181_s13 + $0xb5] sm:$0xff]  ;;  %v1880_v39 = vld [vmem:[%s3181_s13 + $0xbd] sm:$0xff] }
 0x1e7   : > { %v820_v17 = vpop.f32.mrf.mxu2 }
 0x1e8   : > { %v864_v18 = vadd.f32 %v820_v17, %v609_v8  ;;  %v611_v19 = vpop.f32.mrf.mxu1  ;;  %v3802_v20 = vpop.f32.mrf.mxu3 }
 0x1ea   : > { %v1319_v45 = vpop.f32.mrf.mxu0  ;;  %v1112_v30 = vadd.f32 %v3746_v63, %v864_v18  ;;  %v612_v63 = vadd.f32 %v611_v19, %v3347_v11  ;;  %v1628_v11 = vld [vmem:[%s3181_s13 + $0x9c] sm:$0xff] }
 0x1eb   : > { %2902 = vmatmul.msk.bf16.gmra.mxu1 %vm307_vm1, %v1654_v0 }
 0x1ec   : > { %2921 = vmatmul.msk.bf16.gmra.mxu2 %vm307_vm1, %v1655_v47  ;;  %v3810_v52 = vadd.f32 %v1316_v50, %v1112_v30  ;;  %v2444_v50 = vld [vmem:[%s4176_s3 + $0x58] sm:$0xff] }
 0x1ed   : > { %2959 = vmatmul.msk.bf16.gmra.mxu0 %vm307_vm1, %v2151_v62  ;;  %2942 = vmatmul.msk.bf16.gmra.mxu3 %vm307_vm1, %v1905_v33  ;;  %v2152_v62 = vpack.c.bf16 %v2124_v35, %v2123_v5  ;;  %v2125_v5 = vld [vmem:[%s3181_s13 + $0xa6] sm:$0xff]  ;;  %v2126_v35 = vld [vmem:[%s3181_s13 + $0xae] sm:$0xff] }
 0x1ee   : > { %2526 = vperm.xlu2 %3019, %v2444_v50   ;;  %v1629_v50 = vld [vmem:[%s3181_s13 + $0xa4] sm:$0xff] }
 0x1ef   : > { %v823_v24 = vpop.f32.mrf.mxu2 }
 0x1f0   : > { %v865_v0 = vadd.f32 %v823_v24, %v612_v63  ;;  %v613_v48 = vpop.f32.mrf.mxu1  ;;  %v3815_v14 = vpop.f32.mrf.mxu3 }
 0x1f1   : > { %v614_v8 = vadd.f32 %v613_v48, %v3361_v23  ;;  %v2448_v23 = vld [vmem:[%s4176_s3 + $0x78] sm:$0xff] }
 0x1f2   : > { %v1321_v38 = vpop.f32.mrf.mxu0  ;;  %v1113_v53 = vadd.f32 %v3759_v21, %v865_v0  ;;  %v1656_v21 = vpack.c.bf16 %v1628_v11, %v1627_v25  ;;  %2546 = vperm.xlu0 %3017, %v2448_v23  }
 0x1f4   : > { %v3821_v58 = vadd.f32 %v1319_v45, %v1113_v53  ;;  %v1906_v45 = vpack.c.bf16 %v1880_v39, %v1879_v34  ;;  %v1881_v34 = vld [vmem:[%s3181_s13 + $0xc5] sm:$0xff]  ;;  %v1882_v39 = vld [vmem:[%s3181_s13 + $0xcd] sm:$0xff] }
 0x1f7   : > { %v825_v17 = vpop.f32.mrf.mxu2 }
 0x1f8   : > { %v866_v18 = vadd.f32 %v825_v17, %v614_v8  ;;  %v616_v19 = vpop.f32.mrf.mxu1  ;;  %v3830_v6 = vpop.f32.mrf.mxu3 }
 0x1fa   : > { %v1324_v30 = vpop.f32.mrf.mxu0  ;;  %v1114_v33 = vadd.f32 %v3774_v51, %v866_v18  ;;  %v617_v51 = vadd.f32 %v616_v19, %v3376_v28  ;;  %v1630_v28 = vld [vmem:[%s3181_s13 + $0xac] sm:$0xff] }
 0x1fb   : > { %2903 = vmatmul.msk.bf16.gmra.mxu1 %vm307_vm1, %v1655_v47 }
 0x1fc   : > { %2922 = vmatmul.msk.bf16.gmra.mxu2 %vm307_vm1, %v1656_v21  ;;  %v3838_v63 = vadd.f32 %v1321_v38, %v1114_v33  ;;  %v2449_v38 = vld [vmem:[%s4176_s3 + $0x80] sm:$0xff] }
 0x1fd   : > { %2960 = vmatmul.msk.bf16.gmra.mxu0 %vm307_vm1, %v2152_v62  ;;  %2943 = vmatmul.msk.bf16.gmra.mxu3 %vm307_vm1, %v1906_v45  ;;  %v2153_v62 = vpack.c.bf16 %v2126_v35, %v2125_v5  ;;  %v2472_v5 = vpop.permute.xlu0 %2471  ;;  %v1632_v35 = vld [vmem:[%s3181_s13 + $0xbc] sm:$0xff] }
 0x1fe   : > { %2551 = vperm.xlu1 %3018, %v2449_v38  }
 0x1ff   : > { %v828_v24 = vpop.f32.mrf.mxu2 }
 0x200   : > { %v867_v47 = vadd.f32 %v828_v24, %v617_v51  ;;  %v618_v0 = vpop.f32.mrf.mxu1  ;;  %v3843_v25 = vpop.f32.mrf.mxu3  ;;  %v1907_v51 = vpack.c.bf16 %v1882_v39, %v1881_v34  ;;  %v1883_v39 = vld [vmem:[%s3181_s13 + $0xd5] sm:$0xff] }
 0x201   : > { %v619_v8 = vadd.f32 %v618_v0, %v3390_v40  ;;  %v2447_v40 = vld [vmem:[%s4176_s3 + $0x70] sm:$0xff] }
 0x202   : > { %v1326_v48 = vpop.f32.mrf.mxu0  ;;  %v1115_v53 = vadd.f32 %v3787_v29, %v867_v47  ;;  %v1657_v29 = vpack.c.bf16 %v1630_v28, %v1629_v50  ;;  %2541 = vperm.xlu2 %3019, %v2447_v40   ;;  %v1631_v28 = vld [vmem:[%s3181_s13 + $0xb4] sm:$0xff] }
 0x204   : > { %v3849_v11 = vadd.f32 %v1324_v30, %v1115_v53 }
 0x207   : > { %v830_v17 = vpop.f32.mrf.mxu2 }
 0x208   : > { %v868_v18 = vadd.f32 %v830_v17, %v619_v8  ;;  %v1487_v19 = vpop.f32.mrf.mxu1  ;;  %v3859_v30 = vpop.f32.mrf.mxu3  ;;  %v2127_v8 = vld [vmem:[%s3181_s13 + $0xb6] sm:$0xff]  ;;  %v2128_v17 = vld [vmem:[%s3181_s13 + $0xbe] sm:$0xff] }
 0x209   : > { %v1577_v33 = vadd.f32 %v1487_v19, %v3451_v61  ;;  %v2154_v34 = vpack.c.bf16 %v2128_v17, %v2127_v8 }
 0x20a   : > { %v2231_v45 = vpop.f32.mrf.mxu0  ;;  %v1116_v23 = vadd.f32 %v3802_v20, %v868_v18 }
 0x20b   : > { %2904 = vmatmul.msk.bf16.gmra.mxu1 %vm307_vm1, %v1656_v21 }
 0x20c   : > { %2923 = vmatmul.msk.bf16.gmra.mxu2 %vm307_vm1, %v1657_v29  ;;  %v3867_v61 = vadd.f32 %v1326_v48, %v1116_v23  ;;  %v2451_v48 = vld [vmem:[%s4176_s3 + $0x90] sm:$0xff] }
 0x20d   : > { %2961 = vmatmul.msk.bf16.gmra.mxu0 %vm307_vm1, %v2153_v62  ;;  %2944 = vmatmul.msk.bf16.gmra.mxu3 %vm307_vm1, %v1907_v51  ;;  %v1658_v62 = vpack.c.bf16 %v1632_v35, %v1631_v28 }
 0x20e   : > { %2561 = vperm.xlu0 %3017, %v2451_v48  }
 0x20f   : > { %v1735_v20 = vpop.f32.mrf.mxu2 }
 0x210   : > { %v1825_v21 = vadd.f32 %v1735_v20, %v1577_v33  ;;  %v1489_v24 = vpop.f32.mrf.mxu1  ;;  %v3872_v50 = vpop.f32.mrf.mxu3  ;;  %v1884_v33 = vld [vmem:[%s3181_s13 + $0xdd] sm:$0xff] }
 0x211   : > { %v1578_v47 = vadd.f32 %v1489_v24, %v3464_v57  ;;  %v3884_v57 = vld [vmem:[%s4175_s2] ss:$0 sm:$0xff] }
 0x212   : > { %v2233_v0 = vpop.f32.mrf.mxu0  ;;  %v2073_v53 = vadd.f32 %v3815_v14, %v1825_v21  ;;  %v1908_v21 = vpack.c.bf16 %v1884_v33, %v1883_v39  ;;  %v1633_v33 = vld [vmem:[%s3181_s13 + $0xc4] sm:$0xff] }
 0x214   : > { %v2321_v38 = vadd.f32 %v2231_v45, %v2073_v53 }
 0x216   : > { %v2361_v40 = vadd.f32 %v3884_v57, %v2321_v38  ;;  %v2477_v38 = vpop.permute.xlu0 %2476 }
 0x217   : > { %v1737_v14 = vpop.f32.mrf.mxu2 }
 0x218   : > { %v1826_v18 = vadd.f32 %v1737_v14, %v1578_v47  ;;  %v1492_v19 = vpop.f32.mrf.mxu1  ;;  %v3891_v20 = vpop.f32.mrf.mxu3  ;;  %v2452_v47 = vld [vmem:[%s4176_s3 + $0x98] sm:$0xff] }
 0x219   : > { %v1579_v45 = vadd.f32 %v1492_v19, %v3471_v41  ;;  %2566 = vperm.xlu1 %3018, %v2452_v47   ;;  %v2397_v41 = vmax.f32 %v2361_v40, 0.0  ;;  %v2454_v19 = vld [vmem:[%s4176_s3 + $0xa8] sm:$0xff] }
 0x21a   : > { %v2236_v23 = vpop.f32.mrf.mxu0  ;;  %v2074_v51 = vadd.f32 %v3830_v6, %v1826_v18  ;;  %2576 = vperm.xlu0 %3017, %v2454_v19   ;;  %v2130_v40 = vld [vmem:[%s3181_s13 + $0xce] sm:$0xff]  ;;  %v2457_v19 = vld [vmem:[%s4176_s3 + $0xc0] sm:$0xff] }
 0x21b   : > { %2905 = vmatmul.msk.bf16.gmra.mxu1 %vm307_vm1, %v1657_v29  ;;  %v2649_v8 = vmul.f32 %v2472_v5, %v2397_v41  ;;  %v2482_v5 = vpop.permute.xlu1 %2481 }
 0x21c   : > { %2924 = vmatmul.msk.bf16.gmra.mxu2 %vm307_vm1, %v1658_v62  ;;  %v2322_v24 = vadd.f32 %v2233_v0, %v2074_v51  ;;  %v2129_v51 = vld [vmem:[%s3181_s13 + $0xc6] sm:$0xff] }
 0x21d   : > { %2962 = vmatmul.msk.bf16.gmra.mxu0 %vm307_vm1, %v2154_v34  ;;  %2945 = vmatmul.msk.bf16.gmra.mxu3 %vm307_vm1, %v1908_v21 }
 0x21e   : > { %v2362_v6 = vadd.f32 %v3884_v57, %v2322_v24 }
 0x21f   : > { %v1740_v53 = vpop.f32.mrf.mxu2 }
 0x220   : > { %v1827_v29 = vadd.f32 %v1740_v53, %v1579_v45  ;;  %v2398_v28 = vmax.f32 %v2362_v6, 0.0  ;;  %v1494_v48 = vpop.f32.mrf.mxu1  ;;  %v3903_v18 = vpop.f32.mrf.mxu3  ;;  %v1634_v45 = vld [vmem:[%s3181_s13 + $0xcc] sm:$0xff]  ;;  %v2155_v53 = vpack.c.bf16 %v2130_v40, %v2129_v51 }
 0x221   : > { %v1580_v0 = vadd.f32 %v1494_v48, %v3484_v10  ;;  %v2455_v10 = vld [vmem:[%s4176_s3 + $0xb0] sm:$0xff]  ;;  %v1659_v6 = vpack.c.bf16 %v1634_v45, %v1633_v33 }
 0x222   : > { %v2238_v35 = vpop.f32.mrf.mxu0  ;;  %v2075_v17 = vadd.f32 %v3843_v25, %v1827_v29  ;;  %v2650_v14 = vmul.f32 %v2477_v38, %v2398_v28  ;;  %v2450_v25 = vld [vmem:[%s4176_s3 + $0x88] sm:$0xff]  ;;  %2581 = vperm.xlu1 %3018, %v2455_v10   ;;  %2591 = vperm.xlu0 %3017, %v2457_v19  }
 0x223   : > { %2556 = vperm.xlu2 %3019, %v2450_v25   ;;  %v1885_v38 = vld [vmem:[%s3181_s13 + $0xe5] sm:$0xff]  ;;  %v1886_v29 = vld [vmem:[%s3181_s13 + $0xed] sm:$0xff]  ;;  %v2487_v25 = vpop.permute.xlu1 %2486 }
 0x224   : > { %v2323_v34 = vadd.f32 %v2236_v23, %v2075_v17  ;;  %v2685_v39 = vadd.f32 %v2650_v14, %v2649_v8 }
 0x226   : > { %v2363_v23 = vadd.f32 %v3884_v57, %v2323_v34 }
 0x227   : > { %v1742_v21 = vpop.f32.mrf.mxu2 }
 0x228   : > { %v1828_v24 = vadd.f32 %v1742_v21, %v1580_v0  ;;  %v2399_v47 = vmax.f32 %v2363_v23, 0.0  ;;  %v1497_v41 = vpop.f32.mrf.mxu1  ;;  %v3923_v14 = vpop.f32.mrf.mxu3  ;;  %v1909_v0 = vpack.c.bf16 %v1886_v29, %v1885_v38  ;;  %v2460_v21 = vld [vmem:[%s4176_s3 + $0xd8] sm:$0xff] }
 0x229   : > { %v1581_v28 = vadd.f32 %v1497_v41, %v3491_v2  ;;  %v1635_v41 = vld [vmem:[%s3181_s13 + $0xd4] sm:$0xff]  ;;  %v1636_v38 = vld [vmem:[%s3181_s13 + $0xdc] sm:$0xff] }
 0x22a   : > { %v2241_v48 = vpop.f32.mrf.mxu0  ;;  %v2076_v8 = vadd.f32 %v3859_v30, %v1828_v24  ;;  %v2651_v17 = vmul.f32 %v2482_v5, %v2399_v47  ;;  %v2458_v30 = vld [vmem:[%s4176_s3 + $0xc8] sm:$0xff]  ;;  %2606 = vperm.xlu0 %3017, %v2460_v21   ;;  %v2131_v29 = vld [vmem:[%s3181_s13 + $0xd6] sm:$0xff] }
 0x22b   : > { %2906 = vmatmul.msk.bf16.gmra.mxu1 %vm307_vm1, %v1658_v62  ;;  %2596 = vperm.xlu1 %3018, %v2458_v30   ;;  %v1887_v30 = vld [vmem:[%s3181_s13 + $0xf5] sm:$0xff] }
 0x22c   : > { %v2686_v34 = vadd.f32 %v2685_v39, %v2651_v17  ;;  %2925 = vmatmul.msk.bf16.gmra.mxu2 %vm307_vm1, %v1659_v6  ;;  %v2324_v2 = vadd.f32 %v2238_v35, %v2076_v8  ;;  %v2456_v21 = vld [vmem:[%s4176_s3 + $0xb8] sm:$0xff] }
 0x22d   : > { %2963 = vmatmul.msk.bf16.gmra.mxu0 %vm307_vm1, %v2155_v53  ;;  %2946 = vmatmul.msk.bf16.gmra.mxu3 %vm307_vm1, %v1909_v0  ;;  %v2461_v53 = vld [vmem:[%s4176_s3 + $0xe0] sm:$0xff] }
 0x22e   : > { %v2364_v33 = vadd.f32 %v3884_v57, %v2324_v2 }
 0x22f   : > { %v1745_v10 = vpop.f32.mrf.mxu2 }
 0x230   : > { %v1829_v62 = vadd.f32 %v1745_v10, %v1581_v28  ;;  %v2400_v39 = vmax.f32 %v2364_v33, 0.0  ;;  %v1499_v5 = vpop.f32.mrf.mxu1  ;;  %v3938_v23 = vpop.f32.mrf.mxu3  ;;  %v2132_v28 = vld [vmem:[%s3181_s13 + $0xde] sm:$0xff] }
 0x231   : > { %v1582_v35 = vadd.f32 %v1499_v5, %v3504_v27  ;;  %v2453_v27 = vld [vmem:[%s4176_s3 + $0xa0] sm:$0xff]  ;;  %v2156_v2 = vpack.c.bf16 %v2132_v28, %v2131_v29 }
 0x232   : > { %v2243_v45 = vpop.f32.mrf.mxu0  ;;  %v2077_v51 = vadd.f32 %v3872_v50, %v1829_v62  ;;  %v2652_v40 = vmul.f32 %v2487_v25, %v2400_v39  ;;  %v2492_v50 = vpop.permute.xlu2 %2491  ;;  %2571 = vperm.xlu2 %3019, %v2453_v27   ;;  %v1888_v33 = vld [vmem:[%s3181_s13 + $0xfd] sm:$0xff] }
 0x233   : > { %2611 = vperm.xlu1 %3018, %v2461_v53  }
 0x234   : > { %v2325_v24 = vadd.f32 %v2241_v48, %v2077_v51  ;;  %v2687_v47 = vadd.f32 %v2686_v34, %v2652_v40  ;;  %v1660_v34 = vpack.c.bf16 %v1636_v38, %v1635_v41  ;;  %v2463_v51 = vld [vmem:[%s4176_s3 + $0xf0] sm:$0xff] }
 0x235   : > { %2621 = vperm.xlu0 %3017, %v2463_v51  }
 0x236   : > { %v2365_v48 = vadd.f32 %v3884_v57, %v2325_v24 }
 0x237   : > { %v1747_v8 = vpop.f32.mrf.mxu2 }
 0x238   : > { %v1830_v17 = vadd.f32 %v1747_v8, %v1582_v35  ;;  %v2401_v19 = vmax.f32 %v2365_v48, 0.0  ;;  %v1502_v0 = vpop.f32.mrf.mxu1  ;;  %v3958_v5 = vpop.f32.mrf.mxu3  ;;  %v1910_v35 = vpack.c.bf16 %v1888_v33, %v1887_v30  ;;  %v2466_v48 = vld [vmem:[%s4176_s3 + $0x108] sm:$0xff] }
 0x239   : > { %v1583_v10 = vadd.f32 %v1502_v0, %v3511_v36  ;;  %v2467_v0 = vld [vmem:[%s4176_s3 + $0x110] sm:$0xff] }
 0x23a   : > { %v2246_v25 = vpop.f32.mrf.mxu0  ;;  %v2078_v62 = vadd.f32 %v3891_v20, %v1830_v17  ;;  %v2653_v39 = vmul.f32 %v2492_v50, %v2401_v19  ;;  %v2464_v20 = vld [vmem:[%s4176_s3 + $0xf8] sm:$0xff]  ;;  %2586 = vperm.xlu2 %3019, %v2456_v21   ;;  %v1637_v19 = vld [vmem:[%s3181_s13 + $0xe4] sm:$0xff]  ;;  %v2134_v30 = vld [vmem:[%s3181_s13 + $0xee] sm:$0xff] }
 0x23b   : > { %2907 = vmatmul.msk.bf16.gmra.mxu1 %vm307_vm1, %v1659_v6  ;;  %2626 = vperm.xlu1 %3018, %v2464_v20   ;;  %v1890_v20 = vld [vmem:[%s3181_s13 + $0x10d] sm:$0xff] }
 0x23c   : > { %v2688_v40 = vadd.f32 %v2687_v47, %v2653_v39  ;;  %2926 = vmatmul.msk.bf16.gmra.mxu2 %vm307_vm1, %v1660_v34  ;;  %v2326_v36 = vadd.f32 %v2243_v45, %v2078_v62  ;;  %v2497_v47 = vpop.permute.xlu2 %2496 }
 0x23d   : > { %2964 = vmatmul.msk.bf16.gmra.mxu0 %vm307_vm1, %v2156_v2  ;;  %2947 = vmatmul.msk.bf16.gmra.mxu3 %vm307_vm1, %v1910_v35  ;;  %v2133_v2 = vld [vmem:[%s3181_s13 + $0xe6] sm:$0xff] }
 0x23e   : > { %v2366_v6 = vadd.f32 %v3884_v57, %v2326_v36  ;;  %2636 = vperm.xlu0 %3017, %v2466_v48   ;;  %v1889_v36 = vld [vmem:[%s3181_s13 + $0x105] sm:$0xff] }
 0x23f   : > { %v1750_v24 = vpop.f32.mrf.mxu2 }
 0x240   : > { %v1831_v41 = vadd.f32 %v1750_v24, %v1583_v10  ;;  %v2402_v45 = vmax.f32 %v2366_v6, 0.0  ;;  %v1504_v53 = vpop.f32.mrf.mxu1  ;;  %v3976_v28 = vpop.f32.mrf.mxu3 }
 0x241   : > { %v1584_v27 = vadd.f32 %v1504_v53, %v3524_v44  ;;  %v2459_v44 = vld [vmem:[%s4176_s3 + $0xd0] sm:$0xff] }
 0x242   : > { %v2248_v50 = vpop.f32.mrf.mxu0  ;;  %v2079_v38 = vadd.f32 %v3903_v18, %v1831_v41  ;;  %v2654_v29 = vmul.f32 %v2497_v47, %v2402_v45  ;;  %v1638_v18 = vld [vmem:[%s3181_s13 + $0xec] sm:$0xff]  ;;  %2601 = vperm.xlu2 %3019, %v2459_v44   ;;  %v1911_v45 = vpack.c.bf16 %v1890_v20, %v1889_v36 }
 0x243   : > { %2641 = vperm.xlu1 %3018, %v2467_v0   ;;  %v1661_v35 = vpack.c.bf16 %v1638_v18, %v1637_v19 }
 0x244   : > { %v2327_v8 = vadd.f32 %v2246_v25, %v2079_v38  ;;  %v2689_v17 = vadd.f32 %v2688_v40, %v2654_v29  ;;  %v2502_v25 = vpop.permute.xlu0 %2501  ;;  %v2157_v40 = vpack.c.bf16 %v2134_v30, %v2133_v2  ;;  %v2462_v38 = vld [vmem:[%s4176_s3 + $0xe8] sm:$0xff]  ;;  %v2507_v29 = vpop.permute.xlu1 %2506  ;;  %v1639_v30 = vld [vmem:[%s3181_s13 + $0xf4] sm:$0xff] }
 0x246   : > { %v2367_v33 = vadd.f32 %v3884_v57, %v2327_v8 }
 0x247   : > { %v1752_v10 = vpop.f32.mrf.mxu2 }
 0x248   : > { %v1832_v62 = vadd.f32 %v1752_v10, %v1584_v27  ;;  %v2403_v39 = vmax.f32 %v2367_v33, 0.0  ;;  %v1507_v51 = vpop.f32.mrf.mxu1  ;;  %v3996_v41 = vpop.f32.mrf.mxu3  ;;  %v2465_v33 = vld [vmem:[%s4176_s3 + $0x100] sm:$0xff] }
 0x249   : > { %v1585_v21 = vadd.f32 %v1507_v51, %v3531_v32  ;;  %v1640_v10 = vld [vmem:[%s3181_s13 + $0xfc] sm:$0xff] }
 0x24a   : > { %v2251_v6 = vpop.f32.mrf.mxu0  ;;  %v2080_v24 = vadd.f32 %v3923_v14, %v1832_v62  ;;  %v2655_v47 = vmul.f32 %v2502_v25, %v2403_v39  ;;  %2616 = vperm.xlu2 %3019, %v2462_v38   ;;  %v2135_v25 = vld [vmem:[%s3181_s13 + $0xf6] sm:$0xff]  ;;  %v2136_v62 = vld [vmem:[%s3181_s13 + $0xfe] sm:$0xff]  ;;  %v1662_v20 = vpack.c.bf16 %v1640_v10, %v1639_v30 }
 0x24b   : > { %2908 = vmatmul.msk.bf16.gmra.mxu1 %vm307_vm1, %v1660_v34  ;;  %v1641_v10 = vld [vmem:[%s3181_s13 + $0x104] sm:$0xff] }
 0x24c   : > { %v2690_v53 = vadd.f32 %v2689_v17, %v2655_v47  ;;  %2927 = vmatmul.msk.bf16.gmra.mxu2 %vm307_vm1, %v1661_v35  ;;  %v2328_v27 = vadd.f32 %v2248_v50, %v2080_v24  ;;  %v1892_v24 = vld [vmem:[%s3181_s13 + $0x11d] sm:$0xff] }
 0x24d   : > { %2965 = vmatmul.msk.bf16.gmra.mxu0 %vm307_vm1, %v2157_v40  ;;  %2948 = vmatmul.msk.bf16.gmra.mxu3 %vm307_vm1, %v1911_v45 }
 0x24e   : > { %v2368_v32 = vadd.f32 %v3884_v57, %v2328_v27 }
 0x24f   : > { %v1755_v14 = vpop.f32.mrf.mxu2 }
 0x250   : > { %v1833_v34 = vadd.f32 %v1755_v14, %v1585_v21  ;;  %v2404_v48 = vmax.f32 %v2368_v32, 0.0  ;;  %v1509_v8 = vpop.f32.mrf.mxu1  ;;  %v4008_v44 = vpop.f32.mrf.mxu3  ;;  %v2158_v21 = vpack.c.bf16 %v2136_v62, %v2135_v25  ;;  %v1642_v25 = vld [vmem:[%s3181_s13 + $0x10c] sm:$0xff] }
 0x251   : > { %v1586_v50 = vadd.f32 %v1509_v8, %v3544_v12  ;;  %v2137_v62 = vld [vmem:[%s3181_s13 + $0x106] sm:$0xff] }
 0x252   : > { %v2253_v17 = vpop.f32.mrf.mxu0  ;;  %v2081_v19 = vadd.f32 %v3938_v23, %v1833_v34  ;;  %v2656_v0 = vmul.f32 %v2507_v29, %v2404_v48  ;;  %2631 = vperm.xlu2 %3019, %v2465_v33   ;;  %v2512_v23 = vpop.permute.xlu2 %2511  ;;  %v2468_v34 = vld [vmem:[%s4176_s3 + $0x118] sm:$0xff] }
 0x254   : > { %v2329_v18 = vadd.f32 %v2251_v6, %v2081_v19  ;;  %v2691_v2 = vadd.f32 %v2690_v53, %v2656_v0  ;;  %v1891_v6 = vld [vmem:[%s3181_s13 + $0x115] sm:$0xff] }
 0x255   : > { %v1912_v32 = vpack.c.bf16 %v1892_v24, %v1891_v6  ;;  %v1893_v6 = vld [vmem:[%s3181_s13 + $0x125] sm:$0xff]  ;;  %v1894_v24 = vld [vmem:[%s3181_s13 + $0x12d] sm:$0xff] }
 0x256   : > { %v2369_v12 = vadd.f32 %v3884_v57, %v2329_v18 }
 0x257   : > { %v1757_v39 = vpop.f32.mrf.mxu2 }
 0x258   : > { %v1834_v51 = vadd.f32 %v1757_v39, %v1586_v50  ;;  %v2405_v40 = vmax.f32 %v2369_v12, 0.0  ;;  %v1512_v36 = vpop.f32.mrf.mxu1  ;;  %v4022_v38 = vpop.f32.mrf.mxu3  ;;  %v2138_v12 = vld [vmem:[%s3181_s13 + $0x10e] sm:$0xff] }
 0x259   : > { %v1587_v47 = vadd.f32 %v1512_v36, %v3551_v31 }
 0x25a   : > { %v2256_v45 = vpop.f32.mrf.mxu0  ;;  %v2082_v53 = vadd.f32 %v3958_v5, %v1834_v51  ;;  %v2657_v27 = vmul.f32 %v2512_v23, %v2405_v40  ;;  %2646 = vperm.xlu2 %3019, %v2468_v34   ;;  %v2522_v51 = vpop.permute.xlu1 %2521 }
 0x25b   : > { %2909 = vmatmul.msk.bf16.gmra.mxu1 %vm307_vm1, %v1661_v35  ;;  %v2517_v35 = vpop.permute.xlu0 %2516 }
 0x25c   : > { %v2692_v14 = vadd.f32 %v2691_v2, %v2657_v27  ;;  %2928 = vmatmul.msk.bf16.gmra.mxu2 %vm307_vm1, %v1662_v20  ;;  %v2330_v29 = vadd.f32 %v2253_v17, %v2082_v53 }
 0x25d   : > { %2966 = vmatmul.msk.bf16.gmra.mxu0 %vm307_vm1, %v2158_v21  ;;  %2949 = vmatmul.msk.bf16.gmra.mxu3 %vm307_vm1, %v1912_v32  ;;  %v1663_v21 = vpack.c.bf16 %v1642_v25, %v1641_v10  ;;  %v2139_v10 = vld [vmem:[%s3181_s13 + $0x116] sm:$0xff]  ;;  %v2140_v25 = vld [vmem:[%s3181_s13 + $0x11e] sm:$0xff] }
 0x25e   : > { %v2370_v31 = vadd.f32 %v3884_v57, %v2330_v29 }
 0x25f   : > { %v1760_v5 = vpop.f32.mrf.mxu2 }
 0x260   : > { %v1835_v48 = vadd.f32 %v1760_v5, %v1587_v47  ;;  %v2406_v8 = vmax.f32 %v2370_v31, 0.0  ;;  %v1514_v50 = vpop.f32.mrf.mxu1  ;;  %v4034_v2 = vpop.f32.mrf.mxu3 }
 0x261   : > { %v1588_v17 = vadd.f32 %v1514_v50, %v3564_v56 }
 0x262   : > { %v2258_v19 = vpop.f32.mrf.mxu0  ;;  %v2083_v0 = vadd.f32 %v3976_v28, %v1835_v48  ;;  %v2658_v18 = vmul.f32 %v2517_v35, %v2406_v8  ;;  %v2159_v28 = vpack.c.bf16 %v2138_v12, %v2137_v62 }
 0x264   : > { %v2331_v30 = vadd.f32 %v2256_v45, %v2083_v0  ;;  %v2693_v33 = vadd.f32 %v2692_v14, %v2658_v18  ;;  %v1913_v14 = vpack.c.bf16 %v1894_v24, %v1893_v6 }
 0x266   : > { %v2371_v39 = vadd.f32 %v3884_v57, %v2331_v30  ;;  %v1643_v30 = vld [vmem:[%s3181_s13 + $0x114] sm:$0xff] }
 0x267   : > { %v1762_v23 = vpop.f32.mrf.mxu2 }
 0x268   : > { %v1836_v40 = vadd.f32 %v1762_v23, %v1588_v17  ;;  %v2407_v56 = vmax.f32 %v2371_v39, 0.0  ;;  %v1517_v36 = vpop.f32.mrf.mxu1  ;;  %v4045_v32 = vpop.f32.mrf.mxu3 }
 0x269   : > { %v1589_v47 = vadd.f32 %v1517_v36, %v3571_v37  ;;  %v2532_v39 = vpop.permute.xlu0 %2531  ;;  %v1896_v36 = vld [vmem:[%s3181_s13 + $0x13d] sm:$0xff] }
 0x26a   : > { %v2261_v53 = vpop.f32.mrf.mxu0  ;;  %v2084_v45 = vadd.f32 %v3996_v41, %v1836_v40  ;;  %v2659_v27 = vmul.f32 %v2522_v51, %v2407_v56  ;;  %v2527_v41 = vpop.permute.xlu2 %2526  ;;  %v1895_v56 = vld [vmem:[%s3181_s13 + $0x135] sm:$0xff] }
 0x26b   : > { %2910 = vmatmul.msk.bf16.gmra.mxu1 %vm307_vm1, %v1662_v20 }
 0x26c   : > { %v2694_v29 = vadd.f32 %v2693_v33, %v2659_v27  ;;  %2929 = vmatmul.msk.bf16.gmra.mxu2 %vm307_vm1, %v1663_v21  ;;  %v2332_v34 = vadd.f32 %v2258_v19, %v2084_v45  ;;  %v1644_v33 = vld [vmem:[%s3181_s13 + $0x11c] sm:$0xff]  ;;  %v1914_v45 = vpack.c.bf16 %v1896_v36, %v1895_v56 }
 0x26d   : > { %2967 = vmatmul.msk.bf16.gmra.mxu0 %vm307_vm1, %v2159_v28  ;;  %2950 = vmatmul.msk.bf16.gmra.mxu3 %vm307_vm1, %v1913_v14  ;;  %v1664_v40 = vpack.c.bf16 %v1644_v33, %v1643_v30 }
 0x26e   : > { %v2372_v31 = vadd.f32 %v3884_v57, %v2332_v34 }
 0x26f   : > { %v1765_v37 = vpop.f32.mrf.mxu2 }
 0x270   : > { %v1837_v5 = vadd.f32 %v1765_v37, %v1589_v47  ;;  %v2408_v35 = vmax.f32 %v2372_v31, 0.0  ;;  %v1519_v20 = vpop.f32.mrf.mxu1  ;;  %v4054_v19 = vpop.f32.mrf.mxu3 }
 0x271   : > { %v1590_v48 = vadd.f32 %v1519_v20, %v3582_v9 }
 0x272   : > { %v2263_v8 = vpop.f32.mrf.mxu0  ;;  %v2085_v50 = vadd.f32 %v4008_v44, %v1837_v5  ;;  %v2660_v17 = vmul.f32 %v2527_v41, %v2408_v35  ;;  %v2160_v44 = vpack.c.bf16 %v2140_v25, %v2139_v10  ;;  %v2542_v10 = vpop.permute.xlu2 %2541 }
 0x274   : > { %v2333_v0 = vadd.f32 %v2261_v53, %v2085_v50  ;;  %v2695_v18 = vadd.f32 %v2694_v29, %v2660_v17  ;;  %v1645_v50 = vld [vmem:[%s3181_s13 + $0x124] sm:$0xff]  ;;  %v1646_v17 = vld [vmem:[%s3181_s13 + $0x12c] sm:$0xff] }
 0x276   : > { %v2373_v62 = vadd.f32 %v3884_v57, %v2333_v0  ;;  %v2141_v0 = vld [vmem:[%s3181_s13 + $0x126] sm:$0xff] }
 0x277   : > { %v1767_v12 = vpop.f32.mrf.mxu2 }
 0x278   : > { %v1838_v23 = vadd.f32 %v1767_v12, %v1590_v48  ;;  %v2409_v9 = vmax.f32 %v2373_v62, 0.0  ;;  %v1522_v51 = vpop.f32.mrf.mxu1  ;;  %v4065_v53 = vpop.f32.mrf.mxu3 }
 0x279   : > { %v1591_v28 = vadd.f32 %v1522_v51, %v3588_v49 }
 0x27a   : > { %v2266_v6 = vpop.f32.mrf.mxu0  ;;  %v2086_v24 = vadd.f32 %v4022_v38, %v1838_v23  ;;  %v2661_v47 = vmul.f32 %v2532_v39, %v2409_v9  ;;  %v2537_v38 = vpop.permute.xlu1 %2536 }
 0x27b   : > { %2911 = vmatmul.msk.bf16.gmra.mxu1 %vm307_vm1, %v1663_v21 }
 0x27c   : > { %v2334_v27 = vadd.f32 %v2263_v8, %v2086_v24  ;;  %v2696_v14 = vadd.f32 %v2695_v18, %v2661_v47  ;;  %2930 = vmatmul.msk.bf16.gmra.mxu2 %vm307_vm1, %v1664_v40  ;;  %v2142_v18 = vld [vmem:[%s3181_s13 + $0x12e] sm:$0xff] }
 0x27d   : > { %2968 = vmatmul.msk.bf16.gmra.mxu0 %vm307_vm1, %v2160_v44  ;;  %2951 = vmatmul.msk.bf16.gmra.mxu3 %vm307_vm1, %v1914_v45  ;;  %v2161_v39 = vpack.c.bf16 %v2142_v18, %v2141_v0 }
 0x27e   : > { %v2374_v29 = vadd.f32 %v3884_v57, %v2334_v27 }
 0x27f   : > { %v1770_v49 = vpop.f32.mrf.mxu2 }
 0x280   : > { %v1839_v34 = vadd.f32 %v1770_v49, %v1591_v28  ;;  %v2410_v31 = vmax.f32 %v2374_v29, 0.0  ;;  %v1524_v21 = vpop.f32.mrf.mxu1  ;;  %v4074_v20 = vpop.f32.mrf.mxu3 }
 0x281   : > { %v1592_v37 = vadd.f32 %v1524_v21, %v3601_v26  ;;  %v1665_v26 = vpack.c.bf16 %v1646_v17, %v1645_v50  ;;  %v2143_v21 = vld [vmem:[%s3181_s13 + $0x136] sm:$0xff] }
 0x282   : > { %v2268_v41 = vpop.f32.mrf.mxu0  ;;  %v2087_v5 = vadd.f32 %v4034_v2, %v1839_v34  ;;  %v2662_v35 = vmul.f32 %v2537_v38, %v2410_v31  ;;  %v1647_v34 = vld [vmem:[%s3181_s13 + $0x134] sm:$0xff]  ;;  %v1648_v31 = vld [vmem:[%s3181_s13 + $0x13c] sm:$0xff] }
 0x283   : > { %v1666_v17 = vpack.c.bf16 %v1648_v31, %v1647_v34 }
 0x284   : > { %v2335_v48 = vadd.f32 %v2266_v6, %v2087_v5  ;;  %v2697_v8 = vadd.f32 %v2696_v14, %v2662_v35  ;;  %v2547_v6 = vpop.permute.xlu0 %2546  ;;  %v2552_v35 = vpop.permute.xlu1 %2551 }
 0x286   : > { %v2375_v30 = vadd.f32 %v3884_v57, %v2335_v48 }
 0x287   : > { %v1772_v33 = vpop.f32.mrf.mxu2 }
 0x288   : > { %v1840_v25 = vadd.f32 %v1772_v33, %v1592_v37  ;;  %v2411_v62 = vmax.f32 %v2375_v30, 0.0  ;;  %v1527_v12 = vpop.f32.mrf.mxu1  ;;  %v2030_v44 = vpop.f32.mrf.mxu3  ;;  %v2144_v37 = vld [vmem:[%s3181_s13 + $0x13e] sm:$0xff] }
 0x289   : > { %v1593_v2 = vadd.f32 %v1527_v12, %v3609_v46 }
 0x28a   : > { %v2271_v23 = vpop.f32.mrf.mxu0  ;;  %v2088_v9 = vadd.f32 %v4045_v32, %v1840_v25  ;;  %v2663_v51 = vmul.f32 %v2542_v10, %v2411_v62 }
 0x28b   : > { %2912 = vmatmul.msk.bf16.gmra.mxu1 %vm307_vm1, %v1664_v40 }
 0x28c   : > { %v2336_v56 = vadd.f32 %v2268_v41, %v2088_v9  ;;  %v2698_v36 = vadd.f32 %v2697_v8, %v2663_v51  ;;  %2931 = vmatmul.msk.bf16.gmra.mxu2 %vm307_vm1, %v1665_v26  ;;  %v2567_v31 = vpop.permute.xlu1 %2566 }
 0x28d   : > { %2969 = vmatmul.msk.bf16.gmra.mxu0 %vm307_vm1, %v2161_v39  ;;  %v2557_v39 = vpop.permute.xlu2 %2556 }
 0x28e   : > { %v2376_v28 = vadd.f32 %v3884_v57, %v2336_v56 }
 0x28f   : > { %v1775_v46 = vpop.f32.mrf.mxu2 }
 0x290   : > { %v1841_v24 = vadd.f32 %v1775_v46, %v1593_v2  ;;  %v2412_v32 = vmax.f32 %v2376_v28, 0.0  ;;  %v1529_v47 = vpop.f32.mrf.mxu1  ;;  %v2033_v29 = vpop.f32.mrf.mxu3 }
 0x291   : > { %v1594_v45 = vadd.f32 %v1529_v47, %v3622_v43  ;;  %v2162_v43 = vpack.c.bf16 %v2144_v37, %v2143_v21  ;;  %v2562_v28 = vpop.permute.xlu0 %2561 }
 0x292   : > { %v2273_v40 = vpop.f32.mrf.mxu0  ;;  %v2089_v27 = vadd.f32 %v4054_v19, %v1841_v24  ;;  %v2664_v14 = vmul.f32 %v2547_v6, %v2412_v32 }
 0x294   : > { %v2337_v49 = vadd.f32 %v2271_v23, %v2089_v27  ;;  %v2699_v38 = vadd.f32 %v2698_v36, %v2664_v14 }
 0x296   : > { %v2377_v41 = vadd.f32 %v3884_v57, %v2337_v49 }
 0x297   : > { %v1777_v5 = vpop.f32.mrf.mxu2 }
 0x298   : > { %v1842_v48 = vadd.f32 %v1777_v5, %v1594_v45  ;;  %v2413_v8 = vmax.f32 %v2377_v41, 0.0  ;;  %v1532_v50 = vpop.f32.mrf.mxu1  ;;  %v2035_v25 = vpop.f32.mrf.mxu3 }
 0x299   : > { %v1595_v0 = vadd.f32 %v1532_v50, %v3634_v1 }
 0x29a   : > { %v2276_v19 = vpop.f32.mrf.mxu0  ;;  %v2090_v18 = vadd.f32 %v4065_v53, %v1842_v48  ;;  %v2665_v30 = vmul.f32 %v2552_v35, %v2413_v8 }
 0x29b   : > { %2913 = vmatmul.msk.bf16.gmra.mxu1 %vm307_vm1, %v1665_v26 }
 0x29c   : > { %v2338_v33 = vadd.f32 %v2273_v40, %v2090_v18  ;;  %v2700_v10 = vadd.f32 %v2699_v38, %v2665_v30  ;;  %2932 = vmatmul.msk.bf16.gmra.mxu2 %vm307_vm1, %v1666_v17  ;;  %v2572_v30 = vpop.permute.xlu2 %2571 }
 0x29d   : > { %2970 = vmatmul.msk.bf16.gmra.mxu0 %vm307_vm1, %v2162_v43 }
 0x29e   : > { %v2378_v62 = vadd.f32 %v3884_v57, %v2338_v33 }
 0x29f   : > { %v1780_v12 = vpop.f32.mrf.mxu2 }
 0x2a0   : > { %v1843_v2 = vadd.f32 %v1780_v12, %v1595_v0  ;;  %v2414_v23 = vmax.f32 %v2378_v62, 0.0  ;;  %v1534_v1 = vpop.f32.mrf.mxu1  ;;  %v2038_v24 = vpop.f32.mrf.mxu3 }
 0x2a1   : > { %v1596_v9 = vadd.f32 %v1534_v1, %v3651_v60 }
 0x2a2   : > { %v2278_v53 = vpop.f32.mrf.mxu0  ;;  %v2091_v51 = vadd.f32 %v4074_v20, %v1843_v2  ;;  %v2666_v26 = vmul.f32 %v2557_v39, %v2414_v23 }
 0x2a4   : > { %v2339_v56 = vadd.f32 %v2276_v19, %v2091_v51  ;;  %v2701_v36 = vadd.f32 %v2700_v10, %v2666_v26  ;;  %v2577_v51 = vpop.permute.xlu0 %2576 }
 0x2a6   : > { %v2379_v46 = vadd.f32 %v3884_v57, %v2339_v56 }
 0x2a7   : > { %v1782_v6 = vpop.f32.mrf.mxu2 }
 0x2a8   : > { %v1844_v32 = vadd.f32 %v1782_v6, %v1596_v9  ;;  %v2415_v47 = vmax.f32 %v2379_v46, 0.0  ;;  %v1537_v45 = vpop.f32.mrf.mxu1  ;;  %v2040_v48 = vpop.f32.mrf.mxu3 }
 0x2a9   : > { %v1597_v40 = vadd.f32 %v1537_v45, %v3660_v15 }
 0x2aa   : > { %v2281_v27 = vpop.f32.mrf.mxu0  ;;  %v2092_v14 = vadd.f32 %v2030_v44, %v1844_v32  ;;  %v2667_v49 = vmul.f32 %v2562_v28, %v2415_v47 }
 0x2ac   : > { %v2340_v60 = vadd.f32 %v2278_v53, %v2092_v14  ;;  %v2702_v38 = vadd.f32 %v2701_v36, %v2667_v49 }
 0x2ae   : > { %v2380_v20 = vadd.f32 %v3884_v57, %v2340_v60 }
 0x2af   : > { %v1785_v34 = vpop.f32.mrf.mxu2 }
 0x2b0   : > { %v2416_v21 = vmax.f32 %v2380_v20, 0.0  ;;  %v1845_v37 = vadd.f32 %v1785_v34, %v1597_v40  ;;  %v1539_v41 = vpop.f32.mrf.mxu1  ;;  %v2043_v39 = vpop.f32.mrf.mxu3 }
 0x2b1   : > { %v1598_v5 = vadd.f32 %v1539_v41, %v3675_v59 }
 0x2b2   : > { %v2283_v35 = vpop.f32.mrf.mxu0  ;;  %v2668_v8 = vmul.f32 %v2567_v31, %v2416_v21  ;;  %v2093_v50 = vadd.f32 %v2033_v29, %v1845_v37 }
 0x2b4   : > { %v2703_v17 = vadd.f32 %v2702_v38, %v2668_v8  ;;  %v2341_v15 = vadd.f32 %v2281_v27, %v2093_v50  ;;  %v2582_v27 = vpop.permute.xlu1 %2581 }
 0x2b6   : > { %v2381_v44 = vadd.f32 %v3884_v57, %v2341_v15 }
 0x2b7   : > { %v1787_v43 = vpop.f32.mrf.mxu2 }
 0x2b8   : > { %v2417_v0 = vmax.f32 %v2381_v44, 0.0  ;;  %v1846_v19 = vadd.f32 %v1787_v43, %v1598_v5  ;;  %v1542_v18 = vpop.f32.mrf.mxu1  ;;  %v2045_v6 = vpop.f32.mrf.mxu3 }
 0x2b9   : > { %v1599_v33 = vadd.f32 %v1542_v18, %v3683_v55  ;;  %v2587_v5 = vpop.permute.xlu2 %2586  ;;  %v2592_v43 = vpop.permute.xlu0 %2591 }
 0x2ba   : > { %v2286_v10 = vpop.f32.mrf.mxu0  ;;  %v2669_v62 = vmul.f32 %v2572_v30, %v2417_v0  ;;  %v2094_v12 = vadd.f32 %v2035_v25, %v1846_v19 }
 0x2bc   : > { %v2704_v59 = vadd.f32 %v2703_v17, %v2669_v62  ;;  %v2342_v2 = vadd.f32 %v2283_v35, %v2094_v12 }
 0x2be   : > { %v2382_v23 = vadd.f32 %v3884_v57, %v2342_v2 }
 0x2bf   : > { %v1790_v29 = vpop.f32.mrf.mxu2 }
 0x2c0   : > { %v2418_v1 = vmax.f32 %v2382_v23, 0.0  ;;  %v1847_v9 = vadd.f32 %v1790_v29, %v1599_v33  ;;  %v1544_v53 = vpop.f32.mrf.mxu1  ;;  %v2048_v31 = vpop.f32.mrf.mxu3 }
 0x2c1   : > { %v1600_v26 = vadd.f32 %v1544_v53, %v3697_v16 }
 0x2c2   : > { %v2288_v56 = vpop.f32.mrf.mxu0  ;;  %v2670_v36 = vmul.f32 %v2577_v51, %v2418_v1  ;;  %v2095_v28 = vadd.f32 %v2038_v24, %v1847_v9 }
 0x2c4   : > { %v2705_v46 = vadd.f32 %v2704_v59, %v2670_v36  ;;  %v2343_v55 = vadd.f32 %v2286_v10, %v2095_v28 }
 0x2c6   : > { %v2383_v25 = vadd.f32 %v3884_v57, %v2343_v55 }
 0x2c7   : > { %v1792_v32 = vpop.f32.mrf.mxu2 }
 0x2c8   : > { %v2419_v47 = vmax.f32 %v2383_v25, 0.0  ;;  %v1848_v45 = vadd.f32 %v1792_v32, %v1600_v26  ;;  %v1547_v40 = vpop.f32.mrf.mxu1  ;;  %v2050_v33 = vpop.f32.mrf.mxu3 }
 0x2c9   : > { %v1601_v14 = vadd.f32 %v1547_v40, %v3707_v22 }
 0x2ca   : > { %v2291_v49 = vpop.f32.mrf.mxu0  ;;  %v2671_v60 = vmul.f32 %v2582_v27, %v2419_v47  ;;  %v2096_v38 = vadd.f32 %v2040_v48, %v1848_v45 }
 0x2cc   : > { %v2706_v20 = vadd.f32 %v2705_v46, %v2671_v60  ;;  %v2344_v16 = vadd.f32 %v2288_v56, %v2096_v38 }
 0x2ce   : > { %v2384_v34 = vadd.f32 %v3884_v57, %v2344_v16 }
 0x2cf   : > { %v1795_v24 = vpop.f32.mrf.mxu2 }
 0x2d0   : > { %v2420_v21 = vmax.f32 %v2384_v34, 0.0  ;;  %v1849_v37 = vadd.f32 %v1795_v24, %v1601_v14  ;;  %v1549_v41 = vpop.f32.mrf.mxu1  ;;  %v2053_v56 = vpop.f32.mrf.mxu3 }
 0x2d1   : > { %v1602_v44 = vadd.f32 %v1549_v41, %v3726_v4  ;;  %v2597_v4 = vpop.permute.xlu1 %2596 }
 0x2d2   : > { %v2293_v35 = vpop.f32.mrf.mxu0  ;;  %v2672_v8 = vmul.f32 %v2587_v5, %v2420_v21  ;;  %v2097_v50 = vadd.f32 %v2043_v39, %v1849_v37 }
 0x2d4   : > { %v2707_v17 = vadd.f32 %v2706_v20, %v2672_v8  ;;  %v2345_v15 = vadd.f32 %v2291_v49, %v2097_v50 }
 0x2d6   : > { %v2385_v22 = vadd.f32 %v3884_v57, %v2345_v15 }
 0x2d7   : > { %v1797_v48 = vpop.f32.mrf.mxu2 }
 0x2d8   : > { %v2421_v0 = vmax.f32 %v2385_v22, 0.0  ;;  %v1850_v19 = vadd.f32 %v1797_v48, %v1602_v44  ;;  %v1552_v18 = vpop.f32.mrf.mxu1  ;;  %v2055_v60 = vpop.f32.mrf.mxu3 }
 0x2d9   : > { %v1603_v39 = vadd.f32 %v1552_v18, %v3737_v54  ;;  %v2602_v54 = vpop.permute.xlu2 %2601 }
 0x2da   : > { %v2296_v30 = vpop.f32.mrf.mxu0  ;;  %v2673_v10 = vmul.f32 %v2592_v43, %v2421_v0  ;;  %v2098_v62 = vadd.f32 %v2045_v6, %v1850_v19 }
 0x2dc   : > { %v2708_v12 = vadd.f32 %v2707_v17, %v2673_v10  ;;  %v2346_v59 = vadd.f32 %v2293_v35, %v2098_v62 }
 0x2de   : > { %v2386_v2 = vadd.f32 %v3884_v57, %v2346_v59 }
 0x2df   : > { %v1800_v23 = vpop.f32.mrf.mxu2 }
 0x2e0   : > { %v2422_v29 = vmax.f32 %v2386_v2, 0.0  ;;  %v1851_v1 = vadd.f32 %v1800_v23, %v1603_v39  ;;  %v1554_v9 = vpop.f32.mrf.mxu1  ;;  %v2058_v15 = vpop.f32.mrf.mxu3 }
 0x2e1   : > { %v1604_v55 = vadd.f32 %v1554_v9, %v3754_v7  ;;  %v2607_v7 = vpop.permute.xlu0 %2606  ;;  %v2617_v2 = vpop.permute.xlu2 %2616 }
 0x2e2   : > { %v2298_v53 = vpop.f32.mrf.mxu0  ;;  %v2674_v51 = vmul.f32 %v2597_v4, %v2422_v29  ;;  %v2099_v26 = vadd.f32 %v2048_v31, %v1851_v1 }
 0x2e4   : > { %v2709_v36 = vadd.f32 %v2708_v12, %v2674_v51  ;;  %v2347_v28 = vadd.f32 %v2296_v30, %v2099_v26 }
 0x2e6   : > { %v2387_v46 = vadd.f32 %v3884_v57, %v2347_v28 }
 0x2e7   : > { %v1802_v6 = vpop.f32.mrf.mxu2 }
 0x2e8   : > { %v2423_v25 = vmax.f32 %v2387_v46, 0.0  ;;  %v1852_v32 = vadd.f32 %v1802_v6, %v1604_v55  ;;  %v1557_v47 = vpop.f32.mrf.mxu1  ;;  %v2060_v39 = vpop.f32.mrf.mxu3 }
 0x2e9   : > { %v1605_v20 = vadd.f32 %v1557_v47, %v3765_v42  ;;  %v2612_v42 = vpop.permute.xlu1 %2611 }
 0x2ea   : > { %v2301_v45 = vpop.f32.mrf.mxu0  ;;  %v2675_v40 = vmul.f32 %v2602_v54, %v2423_v25  ;;  %v2100_v27 = vadd.f32 %v2050_v33, %v1852_v32  ;;  %v4126_v33 = vld [vmem:[%s4175_s2] ss:$0 sm:$0xff] }
 0x2ec   : > { %v2710_v14 = vadd.f32 %v2709_v36, %v2675_v40  ;;  %v2348_v49 = vadd.f32 %v2298_v53, %v2100_v27 }
 0x2ee   : > { %v2388_v38 = vadd.f32 %v3884_v57, %v2348_v49 }
 0x2ef   : > { %v1805_v16 = vpop.f32.mrf.mxu2 }
 0x2f0   : > { %v2424_v34 = vmax.f32 %v2388_v38, 0.0  ;;  %v1853_v24 = vadd.f32 %v1805_v16, %v1605_v20  ;;  %v1559_v31 = vpop.f32.mrf.mxu1  ;;  %v2063_v6 = vpop.f32.mrf.mxu3 }
 0x2f1   : > { %v1606_v50 = vadd.f32 %v1559_v31, %v3782_v13 }
 0x2f2   : > { %v2303_v21 = vpop.f32.mrf.mxu0  ;;  %v2676_v37 = vmul.f32 %v2607_v7, %v2424_v34  ;;  %v2101_v41 = vadd.f32 %v2053_v56, %v1853_v24 }
 0x2f4   : > { %v2711_v5 = vadd.f32 %v2710_v14, %v2676_v37  ;;  %v2349_v35 = vadd.f32 %v2301_v45, %v2101_v41 }
 0x2f6   : > { %v2389_v8 = vadd.f32 %v3884_v57, %v2349_v35 }
 0x2f7   : > { %v1807_v17 = vpop.f32.mrf.mxu2 }
 0x2f8   : > { %v2425_v22 = vmax.f32 %v2389_v8, 0.0  ;;  %v1854_v44 = vadd.f32 %v1807_v17, %v1606_v50  ;;  %v1562_v48 = vpop.f32.mrf.mxu1  ;;  %v2065_v34 = vpop.f32.mrf.mxu3 }
 0x2f9   : > { %v1607_v13 = vadd.f32 %v1562_v48, %v3793_v3  ;;  %v2622_v3 = vpop.permute.xlu0 %2621 }
 0x2fa   : > { %v2306_v43 = vpop.f32.mrf.mxu0  ;;  %v2677_v0 = vmul.f32 %v2612_v42, %v2425_v22  ;;  %v2102_v19 = vadd.f32 %v2055_v60, %v1854_v44 }
 0x2fc   : > { %v2712_v18 = vadd.f32 %v2711_v5, %v2677_v0  ;;  %v2350_v30 = vadd.f32 %v2303_v21, %v2102_v19  ;;  %v2632_v5 = vpop.permute.xlu2 %2631 }
 0x2fe   : > { %v2390_v57 = vadd.f32 %v4126_v33, %v2350_v30 }
 0x2ff   : > { %v1810_v10 = vpop.f32.mrf.mxu2 }
 0x300   : > { %v2426_v62 = vmax.f32 %v2390_v57, 0.0  ;;  %v1855_v12 = vadd.f32 %v1810_v10, %v1607_v13  ;;  %v1564_v59 = vpop.f32.mrf.mxu1  ;;  %v2068_v44 = vpop.f32.mrf.mxu3 }
 0x301   : > { %v1608_v51 = vadd.f32 %v1564_v59, %v3810_v52  ;;  %v2627_v52 = vpop.permute.xlu1 %2626  ;;  %v2637_v0 = vpop.permute.xlu0 %2636 }
 0x302   : > { %v2678_v23 = vmul.f32 %v2617_v2, %v2426_v62  ;;  %v2103_v29 = vadd.f32 %v2058_v15, %v1855_v12  ;;  %v2308_v1 = vpop.f32.mrf.mxu0 }
 0x304   : > { %v2713_v9 = vadd.f32 %v2712_v18, %v2678_v23  ;;  %v2351_v4 = vadd.f32 %v2306_v43, %v2103_v29 }
 0x306   : > { %v2391_v53 = vadd.f32 %v4126_v33, %v2351_v4 }
 0x307   : > { %v1812_v26 = vpop.f32.mrf.mxu2 }
 0x308   : > { %v2427_v56 = vmax.f32 %v2391_v53, 0.0  ;;  %v1856_v36 = vadd.f32 %v1812_v26, %v1608_v51  ;;  %v1567_v28 = vpop.f32.mrf.mxu1  ;;  %v2647_v26 = vpop.permute.xlu2 %2646 }
 0x309   : > { %v1609_v45 = vadd.f32 %v1567_v28, %v3821_v58 }
 0x30a   : > { %v2679_v46 = vmul.f32 %v2622_v3, %v2427_v56  ;;  %v2104_v55 = vadd.f32 %v2060_v39, %v1856_v36  ;;  %v2311_v47 = vpop.f32.mrf.mxu0  ;;  %v2070_v39 = vpop.f32.mrf.mxu3 }
 0x30c   : > { %v2714_v25 = vadd.f32 %v2713_v9, %v2679_v46  ;;  %v2352_v32 = vadd.f32 %v2308_v1, %v2104_v55 }
 0x30e   : > { %v2392_v54 = vadd.f32 %v4126_v33, %v2352_v32 }
 0x30f   : > { %v1815_v40 = vpop.f32.mrf.mxu2 }
 0x310   : > { %v2428_v27 = vmax.f32 %v2392_v54, 0.0  ;;  %v1857_v14 = vadd.f32 %v1815_v40, %v1609_v45  ;;  %v1569_v49 = vpop.f32.mrf.mxu1 }
 0x311   : > { %v1610_v31 = vadd.f32 %v1569_v49, %v3838_v63 }
 0x312   : > { %v2680_v60 = vmul.f32 %v2627_v52, %v2428_v27  ;;  %v2105_v38 = vadd.f32 %v2063_v6, %v1857_v14  ;;  %v2313_v7 = vpop.f32.mrf.mxu0 }
 0x314   : > { %v2715_v20 = vadd.f32 %v2714_v25, %v2680_v60  ;;  %v2353_v16 = vadd.f32 %v2311_v47, %v2105_v38 }
 0x316   : > { %v2393_v24 = vadd.f32 %v4126_v33, %v2353_v16 }
 0x317   : > { %v1817_v21 = vpop.f32.mrf.mxu2 }
 0x318   : > { %v2429_v37 = vmax.f32 %v2393_v24, 0.0  ;;  %v1858_v41 = vadd.f32 %v1817_v21, %v1610_v31  ;;  %v1572_v58 = vpop.f32.mrf.mxu1 }
 0x319   : > { %v1611_v22 = vadd.f32 %v1572_v58, %v3849_v11  ;;  %v2642_v11 = vpop.permute.xlu1 %2641 }
 0x31a   : > { %v2681_v35 = vmul.f32 %v2632_v5, %v2429_v37  ;;  %v2106_v8 = vadd.f32 %v2065_v34, %v1858_v41  ;;  %v2316_v63 = vpop.f32.mrf.mxu0 }
 0x31c   : > { %v2716_v50 = vadd.f32 %v2715_v20, %v2681_v35  ;;  %v2354_v17 = vadd.f32 %v2313_v7, %v2106_v8 }
 0x31e   : > { %v2394_v15 = vadd.f32 %v4126_v33, %v2354_v17 }
 0x31f   : > { %v1820_v48 = vpop.f32.mrf.mxu2 }
 0x320   : > { %v2430_v42 = vmax.f32 %v2394_v15, 0.0  ;;  %v1859_v43 = vadd.f32 %v1820_v48, %v1611_v22  ;;  %v1574_v30 = vpop.f32.mrf.mxu1 }
 0x321   : > { %v1612_v62 = vadd.f32 %v1574_v30, %v3867_v61 }
 0x322   : > { %v2682_v19 = vmul.f32 %v2637_v0, %v2430_v42  ;;  %v2107_v18 = vadd.f32 %v2068_v44, %v1859_v43  ;;  %v2318_v1 = vpop.f32.mrf.mxu0 }
 0x324   : > { %v2717_v57 = vadd.f32 %v2716_v50, %v2682_v19  ;;  %v2355_v13 = vadd.f32 %v2316_v63, %v2107_v18 }
 0x326   : > { %v2395_v10 = vadd.f32 %v4126_v33, %v2355_v13 }
 0x327   : > { %v1822_v12 = vpop.f32.mrf.mxu2 }
 0x328   : > { %v2431_v59 = vmax.f32 %v2395_v10, 0.0  ;;  %v1860_v2 = vadd.f32 %v1822_v12, %v1612_v62 }
 0x32a   : > { %v2683_v23 = vmul.f32 %v2642_v11, %v2431_v59  ;;  %v2108_v29 = vadd.f32 %v2070_v39, %v1860_v2 }
 0x32c   : > { %v2718_v9 = vadd.f32 %v2717_v57, %v2683_v23  ;;  %v2356_v4 = vadd.f32 %v2318_v1, %v2108_v29 }
 0x32e   : > { %v2396_v53 = vadd.f32 %v4126_v33, %v2356_v4 }
 0x330   : > { %v2432_v51 = vmax.f32 %v2396_v53, 0.0 }
 0x332   : > { %v2684_v56 = vmul.f32 %v2647_v26, %v2432_v51 }
 0x334   : > { %v2719_v36 = vadd.f32 %v2718_v9, %v2684_v56 }
 0x336   : > { %v2720_v28 = vrot.slane %v2719_v36, 4 }
 0x338   : > { %v2721_v61 = vadd.f32 %v2720_v28, %v2719_v36 }
 0x33a   : > { %v2722_v3 = vrot.slane %v2721_v61, 2 }
 0x33c   : > { %v2723_v46 = vadd.f32 %v2722_v3, %v2721_v61 }
 0x33e   : > { %v2724_v55 = vrot.slane %v2723_v46, 1 }
 0x340   : > { %v2725_v6 = vadd.f32 %v2724_v55, %v2723_v46 }
 0x342   : > { %v2726_v33 = vmul.f32 0.00390625, %v2725_v6 }
 0x344   : > { %2727 = vst [vmem:[%s189_s6] sm:$0x1] %v2726_v33 }
 0x345   : > { %3049 = shalt.err (!%p3046_p3)
}
 0x346   : > { %2977 = dma.vmem_to_hbm [thread:$0]  (%p3150_p5), %s2740_s7, 16, %s2742_s8, %s2729_s9  }
 0x347 PF: > { %p2983_p4 = scmp.ge.s32.totalorder %s3084_s18, 2  ;;  %s2753_s23 = sand.u32 1, %s3072_s15  }
 0x348   : > { %s2754_s13 = scalar_lea.sflag [#allocation3], %s2753_s23 }
 0x349   : > { %p2980_p7 = pnand %p2983_p4, %p3154_p6 }
 0x34b   : > { %p2981_p8 = pneg %p2980_p7 }
 0x34d   : > { %3067 = dma.done.wait (%p2981_p8), %s2754_s13, 16  }
 0x34e   : > { %3069 = vsyncadd (%p2981_p8), %s2754_s13, 4294967280  ;;  %p14_p9 = scmp.ge.s32.totalorder %s3137_s21, 4   ;;  %s4180_s15 = smov %s3076_s16 }
 0x34f   : > { %s4181_s16 = smov %s3080_s17  ;;  %s4182_s17 = smov %s3148_s24 }
 0x350   : > { %s4183_s18 = smov %s3137_s21  ;;  %16 = sbr.rel (!%p14_p9) target bundleno = 3 (0x3), region = 79 }
 0x355   :  { %2759 = vsyncpa [#allocation3], 1 }
 0x356   :  { %2761 = vsyncpa [#allocation3 + $0x1], 1 }

</bundles_post_ra>
